<compile_context>
chip_gen: v7x
topology: tpu7x:2x2x1
jax: 0.10.0
libtpu: 0.0.40
codegen_flags: <defaults>
</compile_context>

<pallas_src>
import jax
import jax.numpy as jnp
import numpy as np
from jax import lax
from jax.experimental import pallas as pl
from jax.experimental.pallas import tpu as pltpu

EPS = 1e-5
NUM_GROUPS = 32


def _attn_refine_kernel(cols_ref, wmat_ref, g1_ref, b1_ref,
                        w1_ref, g2_ref, b2_ref, gmean_ref, out_ref):
    # cols_ref : (1, 9*Cin, H*W)  im2col'd input for one image (lane = H*W)
    # wmat_ref : (Cout, 9*Cin)    3x3 conv weight, OIHW flattened
    # g1/b1    : (Cout, 1)        GroupNorm affine, 3x3 branch
    # w1_ref   : (Cout, Cout)     1x1 conv weight (out, in)
    # g2/b2    : (Cout, 1)        GroupNorm affine, attention branch
    # gmean_ref: (Cout, Cout)     constant group-mean operator A (1/g per group)
    # out_ref  : (1, Cout, H*W)
    HW = out_ref.shape[-1]
    inv_hw = 1.0 / float(HW)

    cols = cols_ref[0]                                       # (9*Cin, H*W)
    A = gmean_ref[...]                                       # (Cout, Cout)

    # ---- 3x3 conv (stride 1, pad 1, no bias): single lane-dense matmul ----
    acc = jnp.dot(wmat_ref[...], cols,
                  preferred_element_type=jnp.float32)        # (Cout, H*W)

    # ---- GroupNorm(32) over (group channels x H x W) + ReLU ----
    ch_sum = jnp.sum(acc, axis=1, keepdims=True)             # (Cout, 1)
    ch_sq = jnp.sum(acc * acc, axis=1, keepdims=True)        # (Cout, 1)
    mean_c = jnp.dot(A, ch_sum, preferred_element_type=jnp.float32) * inv_hw
    msq_c = jnp.dot(A, ch_sq, preferred_element_type=jnp.float32) * inv_hw
    var_c = jnp.maximum(msq_c - mean_c * mean_c, 0.0)
    fm = (acc - mean_c) * lax.rsqrt(var_c + EPS) * g1_ref[...] + b1_ref[...]
    fm = jnp.maximum(fm, 0.0)                                # (Cout, H*W)

    # ---- channel attention: avg pool -> 1x1 conv -> GroupNorm -> sigmoid ----
    pooled = jnp.sum(fm, axis=1, keepdims=True) * inv_hw     # (Cout, 1)
    se = jnp.dot(w1_ref[...], pooled,
                 preferred_element_type=jnp.float32)         # (Cout, 1)
    se_mean = jnp.dot(A, se, preferred_element_type=jnp.float32)
    se_msq = jnp.dot(A, se * se, preferred_element_type=jnp.float32)
    se_var = jnp.maximum(se_msq - se_mean * se_mean, 0.0)
    se = (se - se_mean) * lax.rsqrt(se_var + EPS) * g2_ref[...] + b2_ref[...]
    se = jax.nn.sigmoid(se)                                  # (Cout, 1)

    out_ref[0] = (fm * se).astype(out_ref.dtype)


def attention_refinement(x_nchw, params):
    """x_nchw: (B, Cin, H, W) f32 -> (B, Cout, H, W) f32. Weights in PyTorch layout."""
    w3, g1, b1, w1, g2, b2 = params          # w3: (Cout, Cin, 3, 3), w1: (Cout, Cout)
    B, Cin, H, W = x_nchw.shape
    Cout = w3.shape[0]
    HW = H * W
    K9 = Cin * 9
    g = Cout // NUM_GROUPS

    # im2col in the wrapper (single fused XLA pass, no NCHW<->NHWC transposes).
    # cols[b, ci*9 + (dy*3+dx), y*W+x] = x_pad[b, ci, y+dy, x+dx]
    xp = jnp.pad(x_nchw, ((0, 0), (0, 0), (1, 1), (1, 1)))
    cols = jnp.stack([xp[:, :, dy:dy + H, dx:dx + W]
                      for dy in range(3) for dx in range(3)], axis=2)
    cols = cols.reshape(B, K9, HW)

    wmat = w3.reshape(Cout, K9)              # OIHW flatten matches cols ordering

    # Constant group-mean operator (hoisted out of the kernel): A[c,c'] = 1/g
    # if c and c' are in the same GroupNorm group, else 0.
    gid = np.arange(Cout) // g
    gmean = jnp.asarray((gid[:, None] == gid[None, :]).astype(np.float32) / g)

    g1c = g1.reshape(Cout, 1)
    b1c = b1.reshape(Cout, 1)
    g2c = g2.reshape(Cout, 1)
    b2c = b2.reshape(Cout, 1)

    const = lambda b: (0, 0)                 # batch-invariant blocks (DMA'd once)

    out = pl.pallas_call(
        _attn_refine_kernel,
        out_shape=jax.ShapeDtypeStruct((B, Cout, HW), jnp.float32),
        grid_spec=pltpu.PrefetchScalarGridSpec(
            num_scalar_prefetch=0,
            grid=(B,),
            in_specs=[
                pl.BlockSpec((1, K9, HW), lambda b: (b, 0, 0)),
                pl.BlockSpec((Cout, K9), const),
                pl.BlockSpec((Cout, 1), const),
                pl.BlockSpec((Cout, 1), const),
                pl.BlockSpec((Cout, Cout), const),
                pl.BlockSpec((Cout, 1), const),
                pl.BlockSpec((Cout, 1), const),
                pl.BlockSpec((Cout, Cout), const),
            ],
            out_specs=pl.BlockSpec((1, Cout, HW), lambda b: (b, 0, 0)),
        ),
        compiler_params=pltpu.CompilerParams(
            dimension_semantics=("parallel",),
            vmem_limit_bytes=32 * 1024 * 1024),
    )(cols, wmat, g1c, b1c, w1, g2c, b2c, gmean)

    # Contiguous reshape only — no HBM transpose pass on the output path.
    return out.reshape(B, Cout, H, W)


# ----------------------- pure-JAX reference (for checking) -----------------
def _group_norm_nchw(x, gamma, beta, groups=NUM_GROUPS, eps=EPS):
    B, C, H, W = x.shape
    g = C // groups
    xr = x.reshape(B, groups, g, H, W)
    mean = jnp.mean(xr, axis=(2, 3, 4), keepdims=True)
    var = jnp.mean((xr - mean) ** 2, axis=(2, 3, 4), keepdims=True)
    xr = (xr - mean) / jnp.sqrt(var + eps)
    x = xr.reshape(B, C, H, W)
    return x * gamma.reshape(1, C, 1, 1) + beta.reshape(1, C, 1, 1)


def _reference(x, params):
    w3, g1, b1, w1, g2, b2 = params
    fm = lax.conv_general_dilated(x, w3, (1, 1), ((1, 1), (1, 1)),
                                  dimension_numbers=('NCHW', 'OIHW', 'NCHW'),
                                  precision=lax.Precision.HIGHEST)
    fm = jnp.maximum(_group_norm_nchw(fm, g1, b1), 0.0)
    pooled = jnp.mean(fm, axis=(2, 3), keepdims=True)            # (B, C, 1, 1)
    se = jnp.einsum('bcij,oc->boij', pooled, w1,
                    precision=lax.Precision.HIGHEST)
    se = jax.nn.sigmoid(_group_norm_nchw(se, g2, b2))
    return fm * se


if __name__ == "__main__":
    B, Cin, Cout, H, W = 2, 32, 64, 16, 16   # Cout must be divisible by 32

    key = jax.random.PRNGKey(0)
    kx, kw3, kw1 = jax.random.split(key, 3)

    x = jax.random.normal(kx, (B, Cin, H, W), jnp.float32)

    # deterministic parameter init (c2_msra_fill ~ kaiming normal for convs,
    # GroupNorm affine defaults: weight = 1, bias = 0); PyTorch weight layouts.
    w3 = jax.random.normal(kw3, (Cout, Cin, 3, 3), jnp.float32) * np.sqrt(2.0 / (9 * Cout))
    g1 = jnp.ones((Cout,), jnp.float32)
    b1 = jnp.zeros((Cout,), jnp.float32)
    w1 = jax.random.normal(kw1, (Cout, Cout), jnp.float32) * np.sqrt(2.0 / Cout)
    g2 = jnp.ones((Cout,), jnp.float32)
    b2 = jnp.zeros((Cout,), jnp.float32)
    params = (w3, g1, b1, w1, g2, b2)

    out = attention_refinement(x, params)
    out = jax.block_until_ready(out)

    ref = jax.block_until_ready(_reference(x, params))
    np.testing.assert_allclose(np.asarray(out), np.asarray(ref),
                               rtol=1e-3, atol=1e-3)
    print("KERNEL_OK")
</pallas_src>

<mosaic_0001>
module attributes {stable_mosaic.version = 11 : i64} {
  func.func @_attn_refine_kernel(%arg0: i32, %arg1: memref<1x288x256xf32, #tpu.memory_space<vmem>>, %arg2: memref<64x288xf32, #tpu.memory_space<vmem>>, %arg3: memref<64x1xf32, #tpu.memory_space<vmem>>, %arg4: memref<64x1xf32, #tpu.memory_space<vmem>>, %arg5: memref<64x64xf32, #tpu.memory_space<vmem>>, %arg6: memref<64x1xf32, #tpu.memory_space<vmem>>, %arg7: memref<64x1xf32, #tpu.memory_space<vmem>>, %arg8: memref<64x64xf32, #tpu.memory_space<vmem>>, %arg9: memref<1x64x256xf32, #tpu.memory_space<vmem>>) attributes {dimension_semantics = [#tpu.dimension_semantics<parallel>], iteration_bounds = array<i64: 2>, scalar_prefetch = 0 : i64, scratch_operands = 0 : i64, tpu.core_type = #tpu.core_type<tc>, window_params = [{transform_indices = @transform_0, window_bounds = array<i64: 1, 288, 256>}, {pipeline_mode = #tpu.pipeline_mode<synchronous>, transform_indices = @transform_1, window_bounds = array<i64: 64, 288>}, {pipeline_mode = #tpu.pipeline_mode<synchronous>, transform_indices = @transform_2, window_bounds = array<i64: 64, 1>}, {pipeline_mode = #tpu.pipeline_mode<synchronous>, transform_indices = @transform_3, window_bounds = array<i64: 64, 1>}, {pipeline_mode = #tpu.pipeline_mode<synchronous>, transform_indices = @transform_4, window_bounds = array<i64: 64, 64>}, {pipeline_mode = #tpu.pipeline_mode<synchronous>, transform_indices = @transform_5, window_bounds = array<i64: 64, 1>}, {pipeline_mode = #tpu.pipeline_mode<synchronous>, transform_indices = @transform_6, window_bounds = array<i64: 64, 1>}, {pipeline_mode = #tpu.pipeline_mode<synchronous>, transform_indices = @transform_7, window_bounds = array<i64: 64, 64>}, {transform_indices = @transform_8, window_bounds = array<i64: 1, 64, 256>}]} {
    %c0 = arith.constant 0 : index
    %c0_0 = arith.constant 0 : index
    %c0_1 = arith.constant 0 : index
    %0 = vector.load %arg1[%c0, %c0_0, %c0_1] : memref<1x288x256xf32, #tpu.memory_space<vmem>>, vector<1x288x256xf32>
    %1 = vector.shape_cast %0 : vector<1x288x256xf32> to vector<288x256xf32>
    %c0_2 = arith.constant 0 : index
    %c0_3 = arith.constant 0 : index
    %2 = vector.load %arg8[%c0_2, %c0_3] : memref<64x64xf32, #tpu.memory_space<vmem>>, vector<64x64xf32>
    %c0_4 = arith.constant 0 : index
    %c0_5 = arith.constant 0 : index
    %3 = vector.load %arg2[%c0_4, %c0_5] : memref<64x288xf32, #tpu.memory_space<vmem>>, vector<64x288xf32>
    %cst = arith.constant dense<0.000000e+00> : vector<64x256xf32>
    %4 = tpu.matmul %3, %1, %cst {dimension_numbers = #tpu.dot_dimension_numbers<[1], [0], [0], [1], [0, 0, 1, 1], [], []>} : vector<64x288xf32>, vector<288x256xf32>, vector<64x256xf32> -> vector<64x256xf32>
    %cst_6 = arith.constant dense<0.000000e+00> : vector<64xf32>
    %5 = vector.multi_reduction <add>, %4, %cst_6 [1] : vector<64x256xf32> to vector<64xf32>
    %6 = vector.shape_cast %5 : vector<64xf32> to vector<64x1xf32>
    %7 = arith.mulf %4, %4 : vector<64x256xf32>
    %cst_7 = arith.constant dense<0.000000e+00> : vector<64xf32>
    %8 = vector.multi_reduction <add>, %7, %cst_7 [1] : vector<64x256xf32> to vector<64xf32>
    %9 = vector.shape_cast %8 : vector<64xf32> to vector<64x1xf32>
    %cst_8 = arith.constant dense<0.000000e+00> : vector<64x1xf32>
    %10 = tpu.matmul %2, %6, %cst_8 {dimension_numbers = #tpu.dot_dimension_numbers<[1], [0], [0], [1], [0, 0, 1, 1], [], []>} : vector<64x64xf32>, vector<64x1xf32>, vector<64x1xf32> -> vector<64x1xf32>
    %cst_9 = arith.constant 3.906250e-03 : f32
    %11 = vector.broadcast %cst_9 : f32 to vector<64x1xf32>
    %12 = arith.mulf %10, %11 : vector<64x1xf32>
    %cst_10 = arith.constant dense<0.000000e+00> : vector<64x1xf32>
    %13 = tpu.matmul %2, %9, %cst_10 {dimension_numbers = #tpu.dot_dimension_numbers<[1], [0], [0], [1], [0, 0, 1, 1], [], []>} : vector<64x64xf32>, vector<64x1xf32>, vector<64x1xf32> -> vector<64x1xf32>
    %cst_11 = arith.constant 3.906250e-03 : f32
    %14 = vector.broadcast %cst_11 : f32 to vector<64x1xf32>
    %15 = arith.mulf %13, %14 : vector<64x1xf32>
    %16 = arith.mulf %12, %12 : vector<64x1xf32>
    %17 = arith.subf %15, %16 : vector<64x1xf32>
    %cst_12 = arith.constant 0.000000e+00 : f32
    %18 = vector.broadcast %cst_12 : f32 to vector<64x1xf32>
    %19 = arith.maximumf %17, %18 : vector<64x1xf32>
    %20 = vector.broadcast %12 : vector<64x1xf32> to vector<64x256xf32>
    %21 = arith.subf %4, %20 : vector<64x256xf32>
    %cst_13 = arith.constant 9.99999974E-6 : f32
    %22 = vector.broadcast %cst_13 : f32 to vector<64x1xf32>
    %23 = arith.addf %19, %22 : vector<64x1xf32>
    %24 = math.rsqrt %23 : vector<64x1xf32>
    %25 = vector.broadcast %24 : vector<64x1xf32> to vector<64x256xf32>
    %26 = arith.mulf %21, %25 : vector<64x256xf32>
    %c0_14 = arith.constant 0 : index
    %c0_15 = arith.constant 0 : index
    %27 = vector.load %arg3[%c0_14, %c0_15] : memref<64x1xf32, #tpu.memory_space<vmem>>, vector<64x1xf32>
    %28 = vector.broadcast %27 : vector<64x1xf32> to vector<64x256xf32>
    %29 = arith.mulf %26, %28 : vector<64x256xf32>
    %c0_16 = arith.constant 0 : index
    %c0_17 = arith.constant 0 : index
    %30 = vector.load %arg4[%c0_16, %c0_17] : memref<64x1xf32, #tpu.memory_space<vmem>>, vector<64x1xf32>
    %31 = vector.broadcast %30 : vector<64x1xf32> to vector<64x256xf32>
    %32 = arith.addf %29, %31 : vector<64x256xf32>
    %cst_18 = arith.constant 0.000000e+00 : f32
    %33 = vector.broadcast %cst_18 : f32 to vector<64x256xf32>
    %34 = arith.maximumf %32, %33 : vector<64x256xf32>
    %cst_19 = arith.constant dense<0.000000e+00> : vector<64xf32>
    %35 = vector.multi_reduction <add>, %34, %cst_19 [1] : vector<64x256xf32> to vector<64xf32>
    %36 = vector.shape_cast %35 : vector<64xf32> to vector<64x1xf32>
    %cst_20 = arith.constant 3.906250e-03 : f32
    %37 = vector.broadcast %cst_20 : f32 to vector<64x1xf32>
    %38 = arith.mulf %36, %37 : vector<64x1xf32>
    %c0_21 = arith.constant 0 : index
    %c0_22 = arith.constant 0 : index
    %39 = vector.load %arg5[%c0_21, %c0_22] : memref<64x64xf32, #tpu.memory_space<vmem>>, vector<64x64xf32>
    %cst_23 = arith.constant dense<0.000000e+00> : vector<64x1xf32>
    %40 = tpu.matmul %39, %38, %cst_23 {dimension_numbers = #tpu.dot_dimension_numbers<[1], [0], [0], [1], [0, 0, 1, 1], [], []>} : vector<64x64xf32>, vector<64x1xf32>, vector<64x1xf32> -> vector<64x1xf32>
    %cst_24 = arith.constant dense<0.000000e+00> : vector<64x1xf32>
    %41 = tpu.matmul %2, %40, %cst_24 {dimension_numbers = #tpu.dot_dimension_numbers<[1], [0], [0], [1], [0, 0, 1, 1], [], []>} : vector<64x64xf32>, vector<64x1xf32>, vector<64x1xf32> -> vector<64x1xf32>
    %42 = arith.mulf %40, %40 : vector<64x1xf32>
    %cst_25 = arith.constant dense<0.000000e+00> : vector<64x1xf32>
    %43 = tpu.matmul %2, %42, %cst_25 {dimension_numbers = #tpu.dot_dimension_numbers<[1], [0], [0], [1], [0, 0, 1, 1], [], []>} : vector<64x64xf32>, vector<64x1xf32>, vector<64x1xf32> -> vector<64x1xf32>
    %44 = arith.mulf %41, %41 : vector<64x1xf32>
    %45 = arith.subf %43, %44 : vector<64x1xf32>
    %cst_26 = arith.constant 0.000000e+00 : f32
    %46 = vector.broadcast %cst_26 : f32 to vector<64x1xf32>
    %47 = arith.maximumf %45, %46 : vector<64x1xf32>
    %48 = arith.subf %40, %41 : vector<64x1xf32>
    %cst_27 = arith.constant 9.99999974E-6 : f32
    %49 = vector.broadcast %cst_27 : f32 to vector<64x1xf32>
    %50 = arith.addf %47, %49 : vector<64x1xf32>
    %51 = math.rsqrt %50 : vector<64x1xf32>
    %52 = arith.mulf %48, %51 : vector<64x1xf32>
    %c0_28 = arith.constant 0 : index
    %c0_29 = arith.constant 0 : index
    %53 = vector.load %arg6[%c0_28, %c0_29] : memref<64x1xf32, #tpu.memory_space<vmem>>, vector<64x1xf32>
    %54 = arith.mulf %52, %53 : vector<64x1xf32>
    %c0_30 = arith.constant 0 : index
    %c0_31 = arith.constant 0 : index
    %55 = vector.load %arg7[%c0_30, %c0_31] : memref<64x1xf32, #tpu.memory_space<vmem>>, vector<64x1xf32>
    %56 = arith.addf %54, %55 : vector<64x1xf32>
    %57 = arith.negf %56 : vector<64x1xf32>
    %58 = math.exp %57 : vector<64x1xf32>
    %cst_32 = arith.constant 1.000000e+00 : f32
    %59 = vector.broadcast %cst_32 : f32 to vector<64x1xf32>
    %60 = arith.addf %59, %58 : vector<64x1xf32>
    %61 = arith.divf %59, %60 : vector<64x1xf32>
    %62 = vector.broadcast %61 : vector<64x1xf32> to vector<64x256xf32>
    %63 = arith.mulf %34, %62 : vector<64x256xf32>
    %c0_33 = arith.constant 0 : index
    %c0_34 = arith.constant 0 : index
    %c0_35 = arith.constant 0 : index
    %64 = vector.load %arg9[%c0_33, %c0_34, %c0_35] : memref<1x64x256xf32, #tpu.memory_space<vmem>>, vector<1x64x256xf32>
    %65 = vector.shape_cast %64 : vector<1x64x256xf32> to vector<64x256xf32>
    %66 = vector.shape_cast %63 : vector<64x256xf32> to vector<1x64x256xf32>
    tpu.vector_store %arg9[%c0_33, %c0_34, %c0_35], %66 {strides = array<i32>} : memref<1x64x256xf32, #tpu.memory_space<vmem>>, vector<1x64x256xf32>,
    return
  }
  func.func @transform_0(%arg0: i32) -> (i32, i32, i32) {
    %c0_i32 = arith.constant 0 : i32
    %c0_i32_0 = arith.constant 0 : i32
    %c0_i32_1 = arith.constant 0 : i32
    return %arg0, %c0_i32, %c0_i32_0 : i32, i32, i32
  }
  func.func @transform_1(%arg0: i32) -> (i32, i32) {
    %c0_i32 = arith.constant 0 : i32
    %c0_i32_0 = arith.constant 0 : i32
    %c0_i32_1 = arith.constant 0 : i32
    return %c0_i32, %c0_i32_0 : i32, i32
  }
  func.func @transform_2(%arg0: i32) -> (i32, i32) {
    %c0_i32 = arith.constant 0 : i32
    %c0_i32_0 = arith.constant 0 : i32
    %c0_i32_1 = arith.constant 0 : i32
    return %c0_i32, %c0_i32_0 : i32, i32
  }
  func.func @transform_3(%arg0: i32) -> (i32, i32) {
    %c0_i32 = arith.constant 0 : i32
    %c0_i32_0 = arith.constant 0 : i32
    %c0_i32_1 = arith.constant 0 : i32
    return %c0_i32, %c0_i32_0 : i32, i32
  }
  func.func @transform_4(%arg0: i32) -> (i32, i32) {
    %c0_i32 = arith.constant 0 : i32
    %c0_i32_0 = arith.constant 0 : i32
    %c0_i32_1 = arith.constant 0 : i32
    return %c0_i32, %c0_i32_0 : i32, i32
  }
  func.func @transform_5(%arg0: i32) -> (i32, i32) {
    %c0_i32 = arith.constant 0 : i32
    %c0_i32_0 = arith.constant 0 : i32
    %c0_i32_1 = arith.constant 0 : i32
    return %c0_i32, %c0_i32_0 : i32, i32
  }
  func.func @transform_6(%arg0: i32) -> (i32, i32) {
    %c0_i32 = arith.constant 0 : i32
    %c0_i32_0 = arith.constant 0 : i32
    %c0_i32_1 = arith.constant 0 : i32
    return %c0_i32, %c0_i32_0 : i32, i32
  }
  func.func @transform_7(%arg0: i32) -> (i32, i32) {
    %c0_i32 = arith.constant 0 : i32
    %c0_i32_0 = arith.constant 0 : i32
    %c0_i32_1 = arith.constant 0 : i32
    return %c0_i32, %c0_i32_0 : i32, i32
  }
  func.func @transform_8(%arg0: i32) -> (i32, i32, i32) {
    %c0_i32 = arith.constant 0 : i32
    %c0_i32_0 = arith.constant 0 : i32
    %c0_i32_1 = arith.constant 0 : i32
    return %arg0, %c0_i32, %c0_i32_0 : i32, i32, i32
  }
}

</mosaic_0001>

<bundles_post_ra>
// kernel: tpu_custom_call.1
= control target key start
LH: loop header
LB: loop body
LE: loop exit
PB: predicated region body
PF: predicated region fallthrough
CT: control target
= control target key end

     0   :  { %s3750_s0 = inlined_call_operand.hbm [shape: f32[2,288,256], index: 0, kind: input, shape index: {}]   ;;  %s3751_s1 = inlined_call_operand.vmem [shape: f32[64,288], index: 1, kind: input, shape index: {}]   ;;  %s3752_s2 = inlined_call_operand.vmem [shape: f32[64,1], index: 2, kind: input, shape index: {}]   ;;  %s3753_s3 = inlined_call_operand.vmem [shape: f32[64,1], index: 3, kind: input, shape index: {}]   ;;  %s3754_s4 = inlined_call_operand.vmem [shape: f32[64,64], index: 4, kind: input, shape index: {}]   ;;  %s3755_s5 = inlined_call_operand.vmem [shape: f32[64,1], index: 5, kind: input, shape index: {}]   ;;  %s3756_s6 = inlined_call_operand.vmem [shape: f32[64,1], index: 6, kind: input, shape index: {}]   ;;  %s3757_s7 = inlined_call_operand.hbm [shape: f32[64,64], index: 7, kind: input, shape index: {}]   ;;  %s3758_s8 = inlined_call_operand.hbm [shape: f32[2,64,256], index: 8, kind: output, shape index: {}]  }
   0x1   :  { %3775 = sst [smem:[#allocation12_spill]] %s3757_s7 }
   0x2   :  { %13 = vsyncpa [#allocation3], 0 }
   0x3   :  { %15 = vsyncpa [#allocation3 + $0x1], 0 }
   0x4   :  { %16 = vsyncpa [#allocation6], 0 }
   0x5   :  { %17 = vsyncpa [#allocation4], 0 }
   0x6   :  { %19 = vsyncpa [#allocation4 + $0x1], 0  ;;  %s2779_s27 = smov 0   ;;  %s2781_s28 = smov 0  }
   0x7   :  { %s2783_s29 = smov 0   ;;  %s2785_s30 = smov 0  }
   0x8 LB: > { %s2800_s9 = sadd.s32 4294967295, %s2721_s30   ;;  %s1997_s10 = sadd.s32 4294967294, %s2721_s30   ;;  %s2721_s30 = sphi %s2785_s30, %s3802_s30   ;;  %s2717_s29 = sphi %s2783_s29, %s3805_s29   ;;  %s2713_s28 = sphi %s2781_s28, %s3804_s28   ;;  %s2709_s27 = sphi %s2779_s27, %s3803_s27  }
   0x9   : > { %p45_p0 = scmp.ne.s32.totalorder %s2713_s28, %s2709_s27  ;;  %p3759_p1 = scmp.eq.s32.totalorder %s2800_s9, 0 }
   0xa   : > { %p222_p3 = scmp.eq.s32.totalorder %s1997_s10, 1  ;;  %p1998_p5 = scmp.ge.s32.totalorder %s2721_s30, 1 }
   0xb   : > { %p2809_p4 = por %p3759_p1, %p45_p0  ;;  %p229_p7 = scmp.lt.s32.totalorder %s2721_s30, 3 }
   0xc   : > { %p2814_p6 = por %p222_p3, %p45_p0  ;;  %s2723_s14 = smov [#allocation5]  }
   0xd   : > { %s3776_s11 = scalar_select %p2809_p4, 1, 0 }
   0xe   : > { %s3777_s12 = scalar_select %p2814_p6, 1, 0 }
   0xf   : > { %p2819_p8 = pnand %p1998_p5, %p229_p7  ;;  %s259_s15 = sshll.u32 %s2723_s14, 4  ;;  %s2823_s15 = int_to_ptr.vmem [resolvable:$true] %s259_s15 }
  0x10   : > { %s2835_s17 = sadd.s32 1, %s2721_s30   ;;  %s32_s18 = sadd.s32 1, %s2717_s29 }
  0x11   : > { %s3778_s13 = scalar_select %p2819_p8, 1, 0 }
  0x12   : > { %p2470_p9 = pneg %p2819_p8  ;;  %3780 = sst [smem:[#allocation11_spill]] %s2835_s17 }
  0x13   : > { %s29_s19 = ssub.s32 %s2721_s30, %s2835_s17  ;;  %s3781_s7 = sld [smem:[#allocation12_spill]] }
  0x14   : > { %p2830_p11 = pnand %p2470_p9, %p3759_p1 }
  0x16   : > { %p2595_p13 = pneg %p2830_p11 }
  0x19   : > { %s2593_s22 = scalar_lea.hbm %s3781_s7, 1024 }
  0x1a   : > { %p2594_p12 = scmp.ne.s32.totalorder %s3781_s7, %s2593_s22  ;;  %p2600_p5 = scmp.lt.u32.totalorder %s2593_s22, %s3781_s7 }
  0x1c   : > { %p2596_p0 = pnand %p2595_p13, %p2594_p12 }
  0x1e   : > { %p2597_p3 = pneg %p2596_p0 }
  0x20   : > { %p2602_p7 = pnand %p2600_p5, %p2597_p3 }
  0x22   : > { %2605 = shalt.err (!%p2602_p7)
}
  0x23   : > { %s2606_s10 = scalar_lea.vmem %s2823_s15, 1024  ;;  %p2614_p2 = scmp.lt.s32.totalorder %s2823_s15, %s2823_s15 }
  0x24   : > { %p2607_p9 = scmp.ne.s32.totalorder %s2823_s15, %s2606_s10  ;;  %p2615_p6 = scmp.lt.s32.totalorder %s2606_s10, %s2606_s10 }
  0x26   : > { %p2609_p10 = pnand %p2607_p9, %p2595_p13  ;;  %p2616_p4 = por %p2615_p6, %p2614_p2 }
  0x28   : > { %p2610_p1 = pneg %p2609_p10 }
  0x2a   : > { %p2617_p8 = pnand %p2616_p4, %p2610_p1 }
  0x2c   : > { %2620 = shalt.err (!%p2617_p8)
}
  0x2d   : > { %s2724_s14 = smov 128   ;;  %s2725_s20 = smov 8  }
  0x2e   : > { %2473 = dma.hbm_to_vmem [thread:$0]  (!%p2830_p11), %s3781_s7, 1024, %s2823_s15, [#allocation6], %s2724_s14, %s2724_s14, %s2725_s20  }
  0x2f   : > { %p30_p2 = scmp.eq.s32.totalorder %s29_s19, 0  ;;  %p39_p1 = scmp.ne.s32.totalorder %s2717_s29, %s2713_s28 }
  0x30   : > { %p40_p4 = scmp.eq.s32.totalorder %s2721_s30, 0  ;;  %p2483_p6 = scmp.lt.s32.totalorder %s2721_s30, 2 }
  0x31   : > { %s2866_s23 = scalar_select %p30_p2, %s2717_s29, %s32_s18  }
  0x32   : > { %p41_p8 = por %p40_p4, %p39_p1  ;;  %p3782_p10 = scmp.eq.s32.totalorder %s2800_s9, 1 }
  0x33   : > { %s273_s25 = sand.u32 1, %s2717_s29   ;;  %s2460_s26 = smul.u32 9216, %s2721_s30 }
  0x34   : > { %p2870_p12 = por %p3782_p10, %p39_p1  ;;  %s2459_s10 = smul.u32 576, %s273_s25 }
  0x35   : > { %s2879_s21 = scalar_lea.hbm %s3750_s0, %s2460_s26  ;;  %p2881_p11 = pnand %p2483_p6, %p41_p8 }
  0x36   : > { %s277_s18 = scalar_lea.vmem [#allocation2], %s2459_s10  ;;  %s2887_s14 = scalar_lea.sflag [#allocation3], %s273_s25 }
  0x37   : > { %s284_s19 = sshll.u32 %s277_s18, 4  ;;  %s2621_s20 = scalar_lea.hbm %s2879_s21, 9216  ;;  %s2885_s19 = int_to_ptr.vmem [resolvable:$true] %s284_s19 }
  0x38   : > { %p2622_p13 = scmp.ne.s32.totalorder %s2879_s21, %s2621_s20  ;;  %p2623_p0 = pneg %p2881_p11 }
  0x39   : > { %s2626_s26 = scalar_lea.hbm %s3750_s0, 18432  ;;  %p2627_p7 = scmp.lt.u32.totalorder %s2879_s21, %s3750_s0 }
  0x3a   : > { %p2624_p3 = pnand %p2623_p0, %p2622_p13  ;;  %p2628_p9 = scmp.lt.u32.totalorder %s2626_s26, %s2621_s20 }
  0x3b   : > { %p2630_p1 = scmp.lt.u32.totalorder %s2621_s20, %s2879_s21 }
  0x3c   : > { %p2625_p5 = pneg %p2624_p3  ;;  %p2629_p2 = por %p2628_p9, %p2627_p7 }
  0x3e   : > { %p2631_p4 = por %p2630_p1, %p2629_p2 }
  0x40   : > { %p2632_p6 = pnand %p2631_p4, %p2625_p5 }
  0x42   : > { %2635 = shalt.err (!%p2632_p6)
}
  0x43   : > { %s2636_s25 = scalar_lea.vmem %s2885_s19, 9216  ;;  %s2726_s10 = smov [#allocation2]  }
  0x44   : > { %p2637_p8 = scmp.ne.s32.totalorder %s2885_s19, %s2636_s25  ;;  %s2641_s18 = sshll.u32 %s2726_s10, 4  ;;  %s2642_s18 = int_to_ptr.vmem [resolvable:$false] %s2641_s18 }
  0x45   : > { %s2643_s7 = scalar_lea.vmem %s2642_s18, 18432  ;;  %p2644_p3 = scmp.lt.s32.totalorder %s2885_s19, %s2642_s18 }
  0x46   : > { %p2639_p10 = pnand %p2637_p8, %p2623_p0  ;;  %p2645_p7 = scmp.lt.s32.totalorder %s2643_s7, %s2636_s25 }
  0x48   : > { %p2640_p13 = pneg %p2639_p10  ;;  %p2646_p9 = por %p2645_p7, %p2644_p3 }
  0x4a   : > { %p2647_p2 = pnand %p2646_p9, %p2640_p13 }
  0x4c   : > { %2650 = shalt.err (!%p2647_p2)
}
  0x4d   : > { %s2727_s20 = smov 256   ;;  %s2728_s17 = smov 16  }
  0x4e   : > { %2477 = dma.hbm_to_vmem [thread:$0]  (!%p2881_p11), %s2879_s21, 9216, %s2885_s19, %s2887_s14, %s2727_s20, %s2727_s20, %s2728_s17  }
  0x4f   : > { %p3785_p0 = scmp.ne.s32.totalorder %s3778_s13, 0 }
  0x50   : > { %s2918_s22 = sand.u32 (!%p3785_p0), 1, %s2713_s28   ;;  %p3786_p5 = scmp.ne.s32.totalorder (!%p3785_p0), %s3776_s11, 0 }
  0x51   : > { %296 = sbr.rel (%p3785_p0) target bundleno = 1791 (0x6ff), region = 52  ;;  %s299_s16 = scalar_lea.sflag (!%p3785_p0), [#allocation3], %s2918_s22 }
  0x52   : > { %s2461_s26 = smul.u32 (!%p3785_p0), 576, %s2918_s22 }
  0x54   : > { %s2922_s25 = scalar_lea.vmem (!%p3785_p0), [#allocation2], %s2461_s26 }
  0x58   : > { %2696 = dma.done.wait (%p3786_p5), %s299_s16, 9216  }
  0x59   : > { %2698 = vsyncadd (%p3786_p5), %s299_s16, 4294958080  ;;  %p3787_p11 = scmp.eq.s32.totalorder %s2800_s9, 0 }
  0x5b   : > { %2700 = dma.done.wait (%p3787_p11), [#allocation6], 1024   ;;  %p3788_p1 = pmov %p3787_p11 }
  0x5c   : > { %v2729_v0 = vmov 0.0   ;;  %v340_v1 = vld [vmem:[%s2922_s25 + $0x8] sm:$0xff]  ;;  %v342_v2 = vld [vmem:[%s2922_s25 + $0x18] sm:$0xff]  ;;  %v339_v3 = vld [vmem:[%s2922_s25] sm:$0xff]  ;;  %vm443_vm0 = vcmask 261120   ;;  %vm758_vm1 = vcmask 523264  }
  0x5d   : > { %2702 = vsyncadd (%p3788_p1), [#allocation6], 4294966272  ;;  %663 = vmatprep.mubr.f32.mxu1 %v2729_v0  ;;  %v2287_v4 = vpack.c.bf16 %v342_v2, %v340_v1  ;;  %v341_v5 = vld [vmem:[%s2922_s25 + $0x10] sm:$0xff]  ;;  %v344_v6 = vld [vmem:[%s2922_s25 + $0x28] sm:$0xff]  ;;  %s2004_s15 = sshll.u32 %s2918_s22, 7  ;;  %s2731_s17 = smov [#allocation7]  }
  0x5e   : > { %v346_v7 = vld [vmem:[%s2922_s25 + $0x38] sm:$0xff]  ;;  %v2289_v8 = vpack.c.bf16 %v341_v5, %v339_v3  ;;  %v343_v10 = vld [vmem:[%s2922_s25 + $0x20] sm:$0xff]  ;;  %v345_v11 = vld [vmem:[%s2922_s25 + $0x30] sm:$0xff]  ;;  %s3657_s19 = scalar_lea.vmem [#allocation7], %s2004_s15  ;;  %s2655_s26 = sshll.u32 %s2731_s17, 4  ;;  %s2656_s26 = int_to_ptr.vmem [resolvable:$false] %s2655_s26 }
  0x5f   : > { %v2291_v9 = vpack.c.bf16 %v346_v7, %v344_v6  ;;  %v348_v12 = vld [vmem:[%s2922_s25 + $0x48] sm:$0xff]  ;;  %2288 = vmatprep.subr.bf16.mxu0 %v2287_v4  ;;  %v350_v13 = vld [vmem:[%s2922_s25 + $0x58] sm:$0xff]  ;;  %v2293_v14 = vpack.c.bf16 %v345_v11, %v343_v10  ;;  %v347_v16 = vld [vmem:[%s2922_s25 + $0x40] sm:$0xff]  ;;  %s1914_s14 = sshll.u32 %s3657_s19, 4  ;;  %s2657_s16 = scalar_lea.vmem %s2656_s26, 4096  ;;  %s3698_s14 = int_to_ptr.vmem [resolvable:$true] %s1914_s14 }
  0x60   : > { %2290 = vmatpush1.bf16.msra.mxu0 %v2289_v8  ;;  %v2295_v15 = vpack.c.bf16 %v350_v13, %v348_v12  ;;  %v349_v17 = vld [vmem:[%s2922_s25 + $0x50] sm:$0xff]  ;;  %v352_v18 = vld [vmem:[%s2922_s25 + $0x68] sm:$0xff]  ;;  %v354_v19 = vld [vmem:[%s2922_s25 + $0x78] sm:$0xff]  ;;  %s2651_s20 = scalar_lea.vmem %s3698_s14, 2048  ;;  %p2658_p10 = scmp.lt.s32.totalorder %s3698_s14, %s2656_s26 }
  0x61   : > { %2292 = vmatprep.subr.bf16.mxu0 %v2291_v9  ;;  %v2297_v20 = vpack.c.bf16 %v349_v17, %v347_v16  ;;  %v2299_v21 = vpack.c.bf16 %v354_v19, %v352_v18  ;;  %v351_v22 = vld [vmem:[%s2922_s25 + $0x60] sm:$0xff]  ;;  %v353_v23 = vld [vmem:[%s2922_s25 + $0x70] sm:$0xff]  ;;  %v356_v24 = vld [vmem:[%s2922_s25 + $0x88] sm:$0xff]  ;;  %p2652_p4 = scmp.ne.s32.totalorder %s3698_s14, %s2651_s20  ;;  %p2659_p13 = scmp.lt.s32.totalorder %s2657_s16, %s2651_s20 }
  0x62   : > { %v358_v25 = vld [vmem:[%s2922_s25 + $0x98] sm:$0xff]  ;;  %v2301_v26 = vpack.c.bf16 %v353_v23, %v351_v22  ;;  %v355_v28 = vld [vmem:[%s2922_s25 + $0x80] sm:$0xff]  ;;  %v357_v29 = vld [vmem:[%s2922_s25 + $0x90] sm:$0xff] }
  0x63   : > { %v2303_v27 = vpack.c.bf16 %v358_v25, %v356_v24  ;;  %v360_v30 = vld [vmem:[%s2922_s25 + $0xa8] sm:$0xff]  ;;  %v362_v31 = vld [vmem:[%s2922_s25 + $0xb8] sm:$0xff]  ;;  %v2305_v32 = vpack.c.bf16 %v357_v29, %v355_v28  ;;  %v359_v34 = vld [vmem:[%s2922_s25 + $0xa0] sm:$0xff]  ;;  %p2653_p6 = pnand %p2652_p4, %p2870_p12  ;;  %p2660_p3 = por %p2659_p13, %p2658_p10 }
  0x64   : > { %2294 = vmatpush1.bf16.msra.mxu0 %v2293_v14  ;;  %v2307_v33 = vpack.c.bf16 %v362_v31, %v360_v30  ;;  %v361_v35 = vld [vmem:[%s2922_s25 + $0xb0] sm:$0xff]  ;;  %v364_v36 = vld [vmem:[%s2922_s25 + $0xc8] sm:$0xff]  ;;  %v366_v37 = vld [vmem:[%s2922_s25 + $0xd8] sm:$0xff] }
  0x65   : > { %2296 = vmatprep.subr.bf16.mxu0 %v2295_v15  ;;  %v2309_v38 = vpack.c.bf16 %v361_v35, %v359_v34  ;;  %v2311_v39 = vpack.c.bf16 %v366_v37, %v364_v36  ;;  %v363_v40 = vld [vmem:[%s2922_s25 + $0xc0] sm:$0xff]  ;;  %v365_v41 = vld [vmem:[%s2922_s25 + $0xd0] sm:$0xff]  ;;  %v420_v42 = vld [vmem:[%s3751_s1 + $0x8] sm:$0xff]  ;;  %p2654_p8 = pneg %p2653_p6 }
  0x66   : > { %v368_v43 = vld [vmem:[%s2922_s25 + $0xe8] sm:$0xff]  ;;  %v370_v44 = vld [vmem:[%s2922_s25 + $0xf8] sm:$0xff]  ;;  %532 = vmatprep.mubr.f32.mxu0 %v420_v42  ;;  %v403_v47 = vld [vmem:[%s2922_s25 + $0x200] sm:$0xff]  ;;  %v2313_v49 = vpack.c.bf16 %v365_v41, %v363_v40 }
  0x67   : > { %v404_v45 = vld [vmem:[%s2922_s25 + $0x208] sm:$0xff]  ;;  %v406_v46 = vld [vmem:[%s2922_s25 + $0x218] sm:$0xff]  ;;  %v405_v48 = vld [vmem:[%s2922_s25 + $0x210] sm:$0xff]  ;;  %v2315_v55 = vpack.c.bf16 %v370_v44, %v368_v43  ;;  %p2661_p7 = pnand %p2660_p3, %p2654_p8 }
  0x68   : > { %2298 = vmatpush1.bf16.msra.mxu0 %v2297_v20  ;;  %v367_v50 = vld [vmem:[%s2922_s25 + $0xe0] sm:$0xff]  ;;  %v369_v51 = vld [vmem:[%s2922_s25 + $0xf0] sm:$0xff]  ;;  %v2972_v52 = vpack.c.bf16 %v406_v46, %v404_v45  ;;  %v2974_v53 = vpack.c.bf16 %v405_v48, %v403_v47  ;;  %v408_v54 = vld [vmem:[%s2922_s25 + $0x228] sm:$0xff] }
  0x69   : > { %2300 = vmatprep.subr.bf16.mxu0 %v2299_v21  ;;  %v410_v56 = vld [vmem:[%s2922_s25 + $0x238] sm:$0xff]  ;;  %v407_v57 = vld [vmem:[%s2922_s25 + $0x220] sm:$0xff]  ;;  %v409_v58 = vld [vmem:[%s2922_s25 + $0x230] sm:$0xff]  ;;  %v2317_v63 = vpack.c.bf16 %v369_v51, %v367_v50 }
  0x6a   : > { %v372_v59 = vld [vmem:[%s2922_s25 + $0x108] sm:$0xff]  ;;  %v374_v60 = vld [vmem:[%s2922_s25 + $0x118] sm:$0xff]  ;;  %2439 = vmatprep.subr.bf16.mxu1 %v2972_v52  ;;  %v2983_v61 = vpack.c.bf16 %v410_v56, %v408_v54  ;;  %v2986_v62 = vpack.c.bf16 %v409_v58, %v407_v57  ;;  %v371_v2 = vld [vmem:[%s2922_s25 + $0x100] sm:$0xff] }
  0x6b   : > { %2441 = vmatpush1.bf16.msra.mxu1 %v2974_v53  ;;  %v2319_v1 = vpack.c.bf16 %v374_v60, %v372_v59  ;;  %v373_v3 = vld [vmem:[%s2922_s25 + $0x110] sm:$0xff]  ;;  %v376_v4 = vld [vmem:[%s2922_s25 + $0x128] sm:$0xff]  ;;  %v378_v5 = vld [vmem:[%s2922_s25 + $0x138] sm:$0xff] }
  0x6c   : > { %2302 = vmatpush1.bf16.msra.mxu0 %v2301_v26  ;;  %2440 = vmatprep.subr.bf16.mxu1 %v2983_v61  ;;  %v430_v6 = vld [vmem:[%s3751_s1 + $0x58] sm:$0xff]  ;;  %v2321_v7 = vpack.c.bf16 %v373_v3, %v371_v2  ;;  %v2323_v8 = vpack.c.bf16 %v378_v5, %v376_v4  ;;  %v375_v9 = vld [vmem:[%s2922_s25 + $0x120] sm:$0xff]  ;;  %v377_v10 = vld [vmem:[%s2922_s25 + $0x130] sm:$0xff] }
  0x6d   : > { %2304 = vmatprep.subr.bf16.mxu0 %v2303_v27  ;;  %v380_v11 = vld [vmem:[%s2922_s25 + $0x148] sm:$0xff]  ;;  %v382_v12 = vld [vmem:[%s2922_s25 + $0x158] sm:$0xff]  ;;  %v433_v13 = vld [vmem:[%s3751_s1 + $0x70] sm:$0xff]  ;;  %v2325_v14 = vpack.c.bf16 %v377_v10, %v375_v9 }
  0x6e   : > { %v2327_v15 = vpack.c.bf16 %v382_v12, %v380_v11  ;;  %v379_v16 = vld [vmem:[%s2922_s25 + $0x140] sm:$0xff]  ;;  %v381_v17 = vld [vmem:[%s2922_s25 + $0x150] sm:$0xff]  ;;  %v384_v18 = vld [vmem:[%s2922_s25 + $0x168] sm:$0xff] }
  0x6f   : > { %2442 = vmatpush1.bf16.msra.mxu1 %v2986_v62  ;;  %v386_v19 = vld [vmem:[%s2922_s25 + $0x178] sm:$0xff]  ;;  %v436_v20 = vld [vmem:[%s3751_s1 + $0x88] sm:$0xff]  ;;  %v2329_v21 = vpack.c.bf16 %v381_v17, %v379_v16  ;;  %v383_v23 = vld [vmem:[%s2922_s25 + $0x160] sm:$0xff] }
  0x70   : > { %2306 = vmatpush1.bf16.msra.mxu0 %v2305_v32  ;;  %v2331_v22 = vpack.c.bf16 %v386_v19, %v384_v18  ;;  %v385_v24 = vld [vmem:[%s2922_s25 + $0x170] sm:$0xff]  ;;  %v388_v25 = vld [vmem:[%s2922_s25 + $0x188] sm:$0xff]  ;;  %v390_v26 = vld [vmem:[%s2922_s25 + $0x198] sm:$0xff] }
  0x71   : > { %2308 = vmatprep.subr.bf16.mxu0 %v2307_v33  ;;  %v439_v27 = vld [vmem:[%s3751_s1 + $0xa0] sm:$0xff]  ;;  %v2333_v28 = vpack.c.bf16 %v385_v24, %v383_v23  ;;  %v2335_v29 = vpack.c.bf16 %v390_v26, %v388_v25  ;;  %v389_v31 = vld [vmem:[%s2922_s25 + $0x190] sm:$0xff]  ;;  %v392_v32 = vld [vmem:[%s2922_s25 + $0x1a8] sm:$0xff] }
  0x72   : > { %2008 = vmatmul.mubr.msk.f32.vlgmr.msra.gmra.mrb[0].mxu1 %vm443_vm0, %v430_v6  ;;  %v387_v30 = vld [vmem:[%s2922_s25 + $0x180] sm:$0xff]  ;;  %v394_v33 = vld [vmem:[%s2922_s25 + $0x1b8] sm:$0xff]  ;;  %v397_v44 = vld [vmem:[%s2922_s25 + $0x1d0] sm:$0xff] }
  0x73   : > { %669 = vmatprep.mubr.f32.mxu1 %v2729_v0  ;;  %v442_v34 = vld [vmem:[%s3751_s1 + $0xb8] sm:$0xff]  ;;  %v2337_v35 = vpack.c.bf16 %v389_v31, %v387_v30  ;;  %v2339_v36 = vpack.c.bf16 %v394_v33, %v392_v32  ;;  %v391_v37 = vld [vmem:[%s2922_s25 + $0x1a0] sm:$0xff]  ;;  %v400_v45 = vld [vmem:[%s2922_s25 + $0x1e8] sm:$0xff] }
  0x74   : > { %2310 = vmatpush1.bf16.msra.mxu0 %v2309_v38  ;;  %v393_v38 = vld [vmem:[%s2922_s25 + $0x1b0] sm:$0xff]  ;;  %v398_v40 = vld [vmem:[%s2922_s25 + $0x1d8] sm:$0xff]  ;;  %v395_v43 = vld [vmem:[%s2922_s25 + $0x1c0] sm:$0xff] }
  0x75   : > { %2312 = vmatprep.subr.bf16.mxu0 %v2311_v39  ;;  %v396_v39 = vld [vmem:[%s2922_s25 + $0x1c8] sm:$0xff]  ;;  %v2341_v41 = vpack.c.bf16 %v393_v38, %v391_v37  ;;  %v402_v46 = vld [vmem:[%s2922_s25 + $0x1f8] sm:$0xff]  ;;  %v2345_v47 = vpack.c.bf16 %v397_v44, %v395_v43  ;;  %v401_v50 = vld [vmem:[%s2922_s25 + $0x1f0] sm:$0xff] }
  0x76   : > { %2009 = vmatmul.mubr.msk.f32.gmra.mrb[2].mxu1 %vm443_vm0, %v433_v13  ;;  %v2343_v42 = vpack.c.bf16 %v398_v40, %v396_v39  ;;  %v2347_v48 = vpack.c.bf16 %v402_v46, %v400_v45  ;;  %v419_v54 = vld [vmem:[%s3751_s1] sm:$0xff]  ;;  %v422_v56 = vld [vmem:[%s3751_s1 + $0x18] sm:$0xff]  ;;  %v429_v58 = vld [vmem:[%s3751_s1 + $0x50] sm:$0xff] }
  0x77   : > { %675 = vmatprep.mubr.f32.mxu1 %v2729_v0  ;;  %v426_v57 = vld [vmem:[%s3751_s1 + $0x38] sm:$0xff]  ;;  %v432_v59 = vld [vmem:[%s3751_s1 + $0x68] sm:$0xff]  ;;  %v431_v60 = vld [vmem:[%s3751_s1 + $0x60] sm:$0xff] }
  0x78   : > { %2314 = vmatpush1.bf16.msra.mxu0 %v2313_v49  ;;  %v399_v49 = vld [vmem:[%s2922_s25 + $0x1e0] sm:$0xff]  ;;  %v441_v2 = vld [vmem:[%s3751_s1 + $0xb0] sm:$0xff]  ;;  %v440_v3 = vld [vmem:[%s3751_s1 + $0xa8] sm:$0xff]  ;;  %s2066_s25 = sshll.u32 %s2800_s9, 11  ;;  %s1901_s9 = scalar_lea.sflag [#allocation4], %s2918_s22 }
  0x79   : > { %2316 = vmatprep.subr.bf16.mxu0 %v2315_v55  ;;  %v2349_v51 = vpack.c.bf16 %v401_v50, %v399_v49  ;;  %v423_v55 = vld [vmem:[%s3751_s1 + $0x20] sm:$0xff]  ;;  %v421_v4 = vld [vmem:[%s3751_s1 + $0x10] sm:$0xff]  ;;  %v424_v5 = vld [vmem:[%s3751_s1 + $0x28] sm:$0xff]  ;;  %s3696_s7 = scalar_lea.hbm %s3758_s8, %s2066_s25 }
  0x7a   : > { %2010 = vmatmul.mubr.msk.f32.gmra.mrb[4].mxu1 %vm443_vm0, %v436_v20  ;;  %v427_v6 = vld [vmem:[%s3751_s1 + $0x40] sm:$0xff] }
  0x7b   : > { %681 = vmatprep.mubr.f32.mxu1 %v2729_v0 }
  0x7c   : > { %2318 = vmatpush1.bf16.msra.mxu0 %v2317_v63  ;;  %v438_v63 = vld [vmem:[%s3751_s1 + $0x98] sm:$0xff] }
  0x7d   : > { %2320 = vmatprep.subr.bf16.mxu0 %v2319_v1  ;;  %v437_v1 = vld [vmem:[%s3751_s1 + $0x90] sm:$0xff] }
  0x7e   : > { %2011 = vmatmul.mubr.msk.f32.gmra.mrb[6].mxu1 %vm443_vm0, %v439_v27 }
  0x7f   : > { %687 = vmatprep.mubr.f32.mxu1 %v2729_v0 }
  0x80   : > { %2322 = vmatpush1.bf16.msra.mxu0 %v2321_v7 }
  0x81   : > { %2324 = vmatprep.subr.bf16.mxu0 %v2323_v8 }
  0x82   : > { %2012 = vmatmul.mubr.msk.f32.gmra.mrb[8].mxu1 %vm443_vm0, %v442_v34 }
  0x84   : > { %2326 = vmatpush1.bf16.msra.mxu0 %v2325_v14 }
  0x85   : > { %2328 = vmatprep.subr.bf16.mxu0 %v2327_v15 }
  0x88   : > { %2330 = vmatpush1.bf16.msra.mxu0 %v2329_v21 }
  0x89   : > { %2332 = vmatprep.subr.bf16.mxu0 %v2331_v22 }
  0x8c   : > { %2334 = vmatpush1.bf16.msra.mxu0 %v2333_v28 }
  0x8d   : > { %2336 = vmatprep.subr.bf16.mxu0 %v2335_v29 }
  0x90   : > { %2338 = vmatpush1.bf16.msra.mxu0 %v2337_v35 }
  0x91   : > { %2340 = vmatprep.subr.bf16.mxu0 %v2339_v36 }
  0x94   : > { %2342 = vmatpush1.bf16.msra.mxu0 %v2341_v41 }
  0x95   : > { %2344 = vmatprep.subr.bf16.mxu0 %v2343_v42 }
  0x98   : > { %2346 = vmatpush1.bf16.msra.mxu0 %v2345_v47 }
  0x99   : > { %2348 = vmatprep.subr.bf16.mxu0 %v2347_v48 }
  0x9c   : > { %2350 = vmatpush1.bf16.msra.mxu0 %v2349_v51 }
  0x9d   : > { %2352 = vmatprep.subr.bf16.mxu0 %v2972_v52  ;;  %v425_v52 = vld [vmem:[%s3751_s1 + $0x30] sm:$0xff] }
  0x9f   : > { %533 = vmatmul.mubr.f32.vlgmr.msra.gmra.mrb[0].mxu0 %v419_v54 }
  0xa0   : > { %538 = vmatprep.mubr.f32.mxu0 %v423_v55  ;;  %2354 = vmatpush1.bf16.msra.mxu0 %v2974_v53  ;;  %v428_v53 = vld [vmem:[%s3751_s1 + $0x48] sm:$0xff] }
  0xa1   : > { %2356 = vmatprep.subr.bf16.mxu0 %v2983_v61  ;;  %v435_v61 = vld [vmem:[%s3751_s1 + $0x80] sm:$0xff] }
  0xa3   : > { %539 = vmatmul.mubr.f32.gmra.mrb[2].mxu0 %v422_v56 }
  0xa4   : > { %544 = vmatprep.mubr.f32.mxu0 %v426_v57  ;;  %2358 = vmatpush1.bf16.msra.mxu0 %v2986_v62  ;;  %v434_v62 = vld [vmem:[%s3751_s1 + $0x78] sm:$0xff] }
  0xa7   : > { %545 = vmatmul.mubr.f32.gmra.mrb[4].mxu0 %v425_v52 }
  0xa8   : > { %550 = vmatprep.mubr.f32.mxu0 %v429_v58 }
  0xab   : > { %551 = vmatmul.mubr.f32.gmra.mrb[6].mxu0 %v428_v53 }
  0xac   : > { %556 = vmatprep.mubr.f32.mxu0 %v432_v59 }
  0xaf   : > { %557 = vmatmul.mubr.f32.gmra.mrb[8].mxu0 %v431_v60 }
  0xb0   : > { %562 = vmatprep.mubr.f32.mxu0 %v435_v61 }
  0xb3   : > { %563 = vmatmul.mubr.f32.gmra.mrb[10].mxu0 %v434_v62 }
  0xb4   : > { %568 = vmatprep.mubr.f32.mxu0 %v438_v63 }
  0xb7   : > { %569 = vmatmul.mubr.f32.gmra.mrb[12].mxu0 %v437_v1 }
  0xb8   : > { %574 = vmatprep.mubr.f32.mxu0 %v441_v2 }
  0xbb   : > { %575 = vmatmul.mubr.f32.gmra.mrb[14].mxu0 %v440_v3 }
  0xbc   : > { %645 = vmatprep.mubr.f32.mxu0 %v2729_v0 }
  0xbf   : > { %2005 = vmatmul.mubr.msk.f32.vlgmr.msra.gmra.mrb[0].mxu0 %vm443_vm0, %v421_v4 }
  0xc0   : > { %651 = vmatprep.mubr.f32.mxu0 %v2729_v0 }
  0xc3   : > { %2006 = vmatmul.mubr.msk.f32.gmra.mrb[2].mxu0 %vm443_vm0, %v424_v5 }
  0xc4   : > { %657 = vmatprep.mubr.f32.mxu0 %v2729_v0 }
  0xc7   : > { %2007 = vmatmul.mubr.msk.f32.gmra.mrb[4].mxu0 %vm443_vm0, %v427_v6 }
 0x145   : > { %v665_v7 = vpop.f32.mrb[0].mxu1 }
 0x146   : > { %v667_v8 = vpop.f32.mrb[1].mxu1 }
 0x149   : > { %v671_v9 = vpop.f32.mrb[2].mxu1 }
 0x14a   : > { %v673_v10 = vpop.f32.mrb[3].mxu1 }
 0x14d   : > { %v677_v11 = vpop.f32.mrb[4].mxu1 }
 0x14e   : > { %v679_v12 = vpop.f32.mrb[5].mxu1 }
 0x151   : > { %v683_v13 = vpop.f32.mrb[6].mxu1 }
 0x152   : > { %v685_v14 = vpop.f32.mrb[7].mxu1 }
 0x155   : > { %v689_v15 = vpop.f32.mrb[8].mxu1 }
 0x156   : > { %v691_v16 = vpop.f32.mrb[9].mxu1 }
 0x17e   : > { %v552_v17 = vpop.f32.mrb[6].mxu0 }
 0x17f   : > { %v3108_v18 = vadd.f32 %v665_v7, %v552_v17  ;;  %v554_v0 = vpop.f32.mrb[7].mxu0  ;;  %v1225_v17 = vld [vmem:[%s3753_s3] sm:$0xff] }
 0x180   : > { %v3110_v19 = vadd.f32 %v667_v8, %v554_v0  ;;  %v1228_v0 = vld [vmem:[%s3753_s3 + $0x18] sm:$0xff] }
 0x181   : > { %v724_v61 = vmul.f32 %v3108_v18, %v3108_v18 }
 0x182   : > { %v558_v20 = vpop.f32.mrb[8].mxu0  ;;  %v703_v21 = vadd.f32 %v3110_v19, %v3108_v18  ;;  %v725_v62 = vmul.f32 %v3110_v19, %v3110_v19 }
 0x183   : > { %v3114_v22 = vadd.f32 %v671_v9, %v558_v20  ;;  %v560_v23 = vpop.f32.mrb[9].mxu0  ;;  %v1163_v20 = vld [vmem:[%s3752_s2 + $0x10] sm:$0xff] }
 0x184   : > { %v3116_v24 = vadd.f32 %v673_v10, %v560_v23  ;;  %704 = vadd.xlane.f32.xlu1 %v703_v21  ;;  %v743_v1 = vadd.f32 %v725_v62, %v724_v61  ;;  %v1166_v21 = vld [vmem:[%s3752_s2 + $0x28] sm:$0xff]  ;;  %v1227_v23 = vld [vmem:[%s3753_s3 + $0x10] sm:$0xff]  ;;  %v3242_v61 = vld [vmem:[#allocation5 + $0x18] sm:$0xff] }
 0x185   : > { %v726_v59 = vmul.f32 %v3114_v22, %v3114_v22 }
 0x186   : > { %v564_v25 = vpop.f32.mrb[10].mxu0  ;;  %v706_v55 = vadd.f32 %v3116_v24, %v3114_v22  ;;  %v727_v60 = vmul.f32 %v3116_v24, %v3116_v24 }
 0x187   : > { %v3118_v26 = vadd.f32 %v677_v11, %v564_v25  ;;  %v566_v27 = vpop.f32.mrb[11].mxu0  ;;  %v3188_v11 = vld [vmem:[#allocation5] sm:$0xff]  ;;  %v1230_v25 = vld [vmem:[%s3753_s3 + $0x28] sm:$0xff] }
 0x188   : > { %v3120_v28 = vadd.f32 %v679_v12, %v566_v27  ;;  %v746_v63 = vadd.f32 %v727_v60, %v726_v59  ;;  %2163 = vmatprep.mubr.msk.f32.mxu1 %vm758_vm1, %v3188_v11  ;;  %v1161_v12 = vld [vmem:[%s3752_s2] sm:$0xff]  ;;  %v3236_v59 = vld [vmem:[#allocation5 + $0x10] sm:$0xff] }
 0x189   : > { %v728_v4 = vmul.f32 %v3118_v26, %v3118_v26  ;;  %v1165_v27 = vld [vmem:[%s3752_s2 + $0x20] sm:$0xff] }
 0x18a   : > { %v570_v29 = vpop.f32.mrb[12].mxu0  ;;  %v709_v58 = vadd.f32 %v3120_v28, %v3118_v26  ;;  %v729_v5 = vmul.f32 %v3120_v28, %v3120_v28 }
 0x18b   : > { %v3122_v30 = vadd.f32 %v683_v13, %v570_v29  ;;  %v572_v31 = vpop.f32.mrb[13].mxu0  ;;  %v2730_v13 = vmov 0   ;;  %v1168_v29 = vld [vmem:[%s3752_s2 + $0x38] sm:$0xff] }
 0x18c   : > { %v3124_v32 = vadd.f32 %v685_v14, %v572_v31  ;;  %v749_v7 = vadd.f32 %v729_v5, %v728_v4  ;;  %2527 = vset.pattern.permute.xlu1 %v2730_v13  ;;  %2528 = vset.pattern.permute.xlu0 %v2730_v13  ;;  %v1226_v14 = vld [vmem:[%s3753_s3 + $0x8] sm:$0xff]  ;;  %v1229_v31 = vld [vmem:[%s3753_s3 + $0x20] sm:$0xff]  ;;  %v3252_v5 = vld [vmem:[#allocation5 + $0x30] sm:$0xff] }
 0x18d   : > { %v730_v2 = vmul.f32 %v3122_v30, %v3122_v30 }
 0x18e   : > { %v576_v33 = vpop.f32.mrb[14].mxu0  ;;  %v712_v52 = vadd.f32 %v3124_v32, %v3122_v30  ;;  %v731_v3 = vmul.f32 %v3124_v32, %v3124_v32 }
 0x18f   : > { %v3126_v34 = vadd.f32 %v689_v15, %v576_v33  ;;  %v578_v35 = vpop.f32.mrb[15].mxu0  ;;  %v1162_v15 = vld [vmem:[%s3752_s2 + $0x8] sm:$0xff]  ;;  %v1167_v33 = vld [vmem:[%s3752_s2 + $0x30] sm:$0xff] }
 0x190   : > { %v3128_v36 = vadd.f32 %v691_v16, %v578_v35  ;;  %v752_v6 = vadd.f32 %v731_v3, %v730_v2  ;;  %v1164_v16 = vld [vmem:[%s3752_s2 + $0x18] sm:$0xff]  ;;  %v3250_v3 = vld [vmem:[#allocation5 + $0x28] sm:$0xff] }
 0x191   : > { %v732_v8 = vmul.f32 %v3126_v34, %v3126_v34 }
 0x192   : > { %v3130_v37 = vpop.f32.mrb[0].mxu0  ;;  %v715_v53 = vadd.f32 %v3128_v36, %v3126_v34  ;;  %v733_v9 = vmul.f32 %v3128_v36, %v3128_v36 }
 0x193   : > { %v3132_v38 = vpop.f32.mrb[1].mxu0  ;;  %v718_v39 = vmul.f32 %v3130_v37, %v3130_v37 }
 0x194   : > { %v694_v40 = vadd.f32 %v3132_v38, %v3130_v37  ;;  %v719_v41 = vmul.f32 %v3132_v38, %v3132_v38  ;;  %v755_v10 = vadd.f32 %v733_v9, %v732_v8  ;;  %v3258_v8 = vld [vmem:[#allocation5 + $0x38] sm:$0xff] }
 0x196   : > { %695 = vadd.xlane.f32.xlu0 %v694_v40  ;;  %v3140_v42 = vpop.f32.mrb[2].mxu0  ;;  %v734_v43 = vadd.f32 %v719_v41, %v718_v39 }
 0x197   : > { %v3142_v44 = vpop.f32.mrb[3].mxu0  ;;  %v720_v45 = vmul.f32 %v3140_v42, %v3140_v42 }
 0x198   : > { %v697_v46 = vadd.f32 %v3142_v44, %v3140_v42  ;;  %v721_v47 = vmul.f32 %v3142_v44, %v3142_v44 }
 0x19a   : > { %698 = vadd.xlane.f32.xlu0 %v697_v46  ;;  %v3150_v48 = vpop.f32.mrb[4].mxu0  ;;  %v737_v49 = vadd.f32 %v721_v47, %v720_v45 }
 0x19b   : > { %v3152_v50 = vpop.f32.mrb[5].mxu0  ;;  %v722_v51 = vmul.f32 %v3150_v48, %v3150_v48 }
 0x19c   : > { %v723_v54 = vmul.f32 %v3152_v50, %v3152_v50  ;;  %v700_v56 = vadd.f32 %v3152_v50, %v3150_v48 }
 0x19e   : > { %707 = vadd.xlane.f32.xlu0 %v706_v55  ;;  %701 = vadd.xlane.f32.xlu1 %v700_v56  ;;  %v740_v57 = vadd.f32 %v723_v54, %v722_v51 }
 0x1a2   : > { %713 = vadd.xlane.f32.xlu0 %v712_v52  ;;  %710 = vadd.xlane.f32.xlu1 %v709_v58  ;;  %v3234_v58 = vld [vmem:[#allocation5 + $0x8] sm:$0xff] }
 0x1a6   : > { %735 = vadd.xlane.f32.xlu0 %v734_v43  ;;  %716 = vadd.xlane.f32.xlu1 %v715_v53 }
 0x1aa   : > { %741 = vadd.xlane.f32.xlu0 %v740_v57  ;;  %738 = vadd.xlane.f32.xlu1 %v737_v49 }
 0x1ae   : > { %747 = vadd.xlane.f32.xlu0 %v746_v63  ;;  %744 = vadd.xlane.f32.xlu1 %v743_v1  ;;  %v3244_v63 = vld [vmem:[#allocation5 + $0x20] sm:$0xff] }
 0x1b2   : > { %753 = vadd.xlane.f32.xlu0 %v752_v6  ;;  %750 = vadd.xlane.f32.xlu1 %v749_v7 }
 0x1b6   : > { %756 = vadd.xlane.f32.xlu1 %v755_v10 }
 0x1c7   : > { %1171 = vperm.xlu1 %2527, %v1161_v12  }
 0x1c8   : > { %1240 = vperm.xlu0 %2528, %v1226_v14  }
 0x1cb   : > { %1176 = vperm.xlu1 %2527, %v1162_v15  }
 0x1cc   : > { %1186 = vperm.xlu0 %2528, %v1164_v16  }
 0x1cf   : > { %1235 = vperm.xlu1 %2527, %v1225_v17  }
 0x1d0   : > { %1250 = vperm.xlu0 %2528, %v1228_v0  }
 0x1d3   : > { %1181 = vperm.xlu1 %2527, %v1163_v20  }
 0x1d4   : > { %1196 = vperm.xlu0 %2528, %v1166_v21  }
 0x1d7   : > { %1245 = vperm.xlu1 %2527, %v1227_v23  }
 0x1d8   : > { %1260 = vperm.xlu0 %2528, %v1230_v25  }
 0x1db   : > { %1191 = vperm.xlu1 %2527, %v1165_v27  }
 0x1dc   : > { %1206 = vperm.xlu0 %2528, %v1168_v29  }
 0x1df   : > { %1255 = vperm.xlu1 %2527, %v1229_v31  }
 0x1e3   : > { %1201 = vperm.xlu1 %2527, %v1167_v33  }
 0x211   : > { %v705_v39 = vpop.xlane.xlu1 %704 }
 0x223   : > { %v696_v35 = vpop.xlane.xlu0 %695 }
 0x227   : > { %v699_v40 = vpop.xlane.xlu0 %698 }
 0x228   : > { %v2359_v41 = vpack.c.bf16 %v699_v40, %v696_v35 }
 0x22a   : > { %2360 = vmatprep.subr.bf16.mxu1 %v2359_v41 }
 0x22b   : > { %2362 = vmatpush3.bf16.msra.mxu1 %v2359_v41  ;;  %v708_v43 = vpop.xlane.xlu0 %707  ;;  %v702_v45 = vpop.xlane.xlu1 %701 }
 0x22c   : > { %v2363_v46 = vpack.c.bf16 %v705_v39, %v702_v45 }
 0x22e   : > { %2364 = vmatprep.subr.bf16.mxu1 %v2363_v46 }
 0x22f   : > { %v714_v47 = vpop.xlane.xlu0 %713  ;;  %2366 = vmatpush3.bf16.msra.mxu1 %v2363_v46  ;;  %v711_v49 = vpop.xlane.xlu1 %710 }
 0x230   : > { %v2367_v51 = vpack.c.bf16 %v711_v49, %v708_v43 }
 0x232   : > { %2368 = vmatprep.subr.bf16.mxu1 %v2367_v51 }
 0x233   : > { %v736_v54 = vpop.xlane.xlu0 %735  ;;  %2370 = vmatpush3.bf16.msra.mxu1 %v2367_v51  ;;  %v717_v55 = vpop.xlane.xlu1 %716 }
 0x234   : > { %v2371_v56 = vpack.c.bf16 %v717_v55, %v714_v47 }
 0x236   : > { %2372 = vmatprep.subr.bf16.mxu1 %v2371_v56 }
 0x237   : > { %v742_v57 = vpop.xlane.xlu0 %741  ;;  %2374 = vmatpush3.bf16.msra.mxu1 %v2371_v56  ;;  %v739_v52 = vpop.xlane.xlu1 %738 }
 0x238   : > { %v2375_v53 = vpack.c.bf16 %v739_v52, %v736_v54 }
 0x23a   : > { %2164 = vmatmul.mubr.msk.f32.vlgmr.msra.gmra.mrb[10].mxu1 %vm758_vm1, %v3234_v58  ;;  %2376 = vmatprep.subr.bf16.mxu1 %v2375_v53 }
 0x23b   : > { %2378 = vmatpush3.bf16.msra.mxu1 %v2375_v53  ;;  %v745_v60 = vpop.xlane.xlu1 %744  ;;  %2166 = vmatprep.mubr.msk.f32.mxu1 %vm758_vm1, %v3236_v59  ;;  %v748_v1 = vpop.xlane.xlu0 %747 }
 0x23c   : > { %v2379_v62 = vpack.c.bf16 %v745_v60, %v742_v57 }
 0x23e   : > { %2167 = vmatmul.mubr.msk.f32.gmra.mrb[12].mxu1 %vm758_vm1, %v3242_v61  ;;  %2380 = vmatprep.subr.bf16.mxu1 %v2379_v62 }
 0x23f   : > { %2382 = vmatpush3.bf16.msra.mxu1 %v2379_v62  ;;  %v751_v2 = vpop.xlane.xlu1 %750  ;;  %2169 = vmatprep.mubr.msk.f32.mxu1 %vm758_vm1, %v3244_v63  ;;  %v754_v6 = vpop.xlane.xlu0 %753 }
 0x240   : > { %v2383_v4 = vpack.c.bf16 %v751_v2, %v748_v1 }
 0x242   : > { %2170 = vmatmul.mubr.msk.f32.gmra.mrb[14].mxu1 %vm758_vm1, %v3250_v3  ;;  %2384 = vmatprep.subr.bf16.mxu1 %v2383_v4 }
 0x243   : > { %2386 = vmatpush3.bf16.msra.mxu1 %v2383_v4  ;;  %v757_v7 = vpop.xlane.xlu1 %756  ;;  %2172 = vmatprep.mubr.msk.f32.mxu1 %vm758_vm1, %v3252_v5 }
 0x244   : > { %v2387_v9 = vpack.c.bf16 %v757_v7, %v754_v6 }
 0x246   : > { %2173 = vmatmul.mubr.msk.f32.gmra.mrb[16].mxu1 %vm758_vm1, %v3258_v8  ;;  %2388 = vmatprep.subr.bf16.mxu1 %v2387_v9 }
 0x247   : > { %2390 = vmatpush3.bf16.msra.mxu1 %v2387_v9  ;;  %2191 = vmatprep.mubr.msk.f32.mxu1 %vm758_vm1, %v3188_v11 }
 0x24a   : > { %2192 = vmatmul.mubr.msk.f32.vlgmr.msra.gmra.mrb[18].mxu1 %vm758_vm1, %v3234_v58 }
 0x24b   : > { %2194 = vmatprep.mubr.msk.f32.mxu1 %vm758_vm1, %v3236_v59 }
 0x24e   : > { %2195 = vmatmul.mubr.msk.f32.gmra.mrb[20].mxu1 %vm758_vm1, %v3242_v61 }
 0x24f   : > { %2197 = vmatprep.mubr.msk.f32.mxu1 %vm758_vm1, %v3244_v63 }
 0x252   : > { %2198 = vmatmul.mubr.msk.f32.gmra.mrb[22].mxu1 %vm758_vm1, %v3250_v3 }
 0x253   : > { %2200 = vmatprep.mubr.msk.f32.mxu1 %vm758_vm1, %v3252_v5 }
 0x256   : > { %2201 = vmatmul.mubr.msk.f32.gmra.mrb[24].mxu1 %vm758_vm1, %v3258_v8 }
 0x30d   : > { %v2165_v10 = vpop.f32.mrb[10].mxu1 }
 0x30e   : > { %v889_v12 = vmul.f32 0.00390625, %v2165_v10  ;;  %v849_v13 = vpop.f32.mrb[11].mxu1 }
 0x30f   : > { %v888_v14 = vmul.f32 0.00390625, %v849_v13 }
 0x310   : > { %1040 = vperm.xlu1 %2527, %v889_v12   ;;  %v1010_v35 = vmul.f32 %v889_v12, %v889_v12 }
 0x311   : > { %1035 = vperm.xlu0 %2528, %v888_v14   ;;  %v2168_v15 = vpop.f32.mrb[12].mxu1  ;;  %v1009_v43 = vmul.f32 %v888_v14, %v888_v14 }
 0x312   : > { %v891_v16 = vmul.f32 0.00390625, %v2168_v15  ;;  %v859_v17 = vpop.f32.mrb[13].mxu1 }
 0x313   : > { %v890_v20 = vmul.f32 0.00390625, %v859_v17 }
 0x314   : > { %1050 = vperm.xlu1 %2527, %v891_v16   ;;  %v1012_v51 = vmul.f32 %v891_v16, %v891_v16 }
 0x315   : > { %v2171_v0 = vpop.f32.mrb[14].mxu1  ;;  %v1011_v57 = vmul.f32 %v890_v20, %v890_v20 }
 0x316   : > { %v893_v21 = vmul.f32 0.00390625, %v2171_v0  ;;  %v869_v23 = vpop.f32.mrb[15].mxu1 }
 0x317   : > { %v892_v27 = vmul.f32 0.00390625, %v869_v23 }
 0x318   : > { %1045 = vperm.xlu1 %2527, %v890_v20   ;;  %1060 = vperm.xlu0 %2528, %v893_v21   ;;  %v1014_v6 = vmul.f32 %v893_v21, %v893_v21 }
 0x319   : > { %v2174_v25 = vpop.f32.mrb[16].mxu1  ;;  %v1013_v12 = vmul.f32 %v892_v27, %v892_v27 }
 0x31a   : > { %v895_v29 = vmul.f32 0.00390625, %v2174_v25  ;;  %v879_v31 = vpop.f32.mrb[17].mxu1 }
 0x31b   : > { %v894_v39 = vmul.f32 0.00390625, %v879_v31 }
 0x31c   : > { %1055 = vperm.xlu1 %2527, %v892_v27   ;;  %1070 = vperm.xlu0 %2528, %v895_v29   ;;  %v1016_v23 = vmul.f32 %v895_v29, %v895_v29 }
 0x31d   : > { %v2193_v33 = vpop.f32.mrb[18].mxu1 }
 0x31e   : > { %v1002_v40 = vmul.f32 0.00390625, %v2193_v33  ;;  %v962_v41 = vpop.f32.mrb[19].mxu1 }
 0x31f   : > { %v1001_v45 = vmul.f32 0.00390625, %v962_v41 }
 0x320   : > { %v1018_v46 = vsub.f32 %v1002_v40, %v1010_v35  ;;  %1065 = vperm.xlu1 %2527, %v894_v39   ;;  %v1015_v35 = vmul.f32 %v894_v39, %v894_v39 }
 0x321   : > { %v1017_v47 = vsub.f32 %v1001_v45, %v1009_v43  ;;  %v2196_v49 = vpop.f32.mrb[20].mxu1 }
 0x322   : > { %v1026_v54 = vmax.f32 %v1018_v46, 0.0  ;;  %v1004_v55 = vmul.f32 0.00390625, %v2196_v49  ;;  %v972_v56 = vpop.f32.mrb[21].mxu1 }
 0x323   : > { %v1025_v52 = vmax.f32 %v1017_v47, 0.0  ;;  %v1003_v53 = vmul.f32 0.00390625, %v972_v56 }
 0x324   : > { %v1090_v60 = vadd.f32 1e-05, %v1026_v54  ;;  %v1020_v62 = vsub.f32 %v1004_v55, %v1012_v51 }
 0x325   : > { %v1089_v1 = vadd.f32 1e-05, %v1025_v52  ;;  %v1019_v2 = vsub.f32 %v1003_v53, %v1011_v57  ;;  %v2199_v4 = vpop.f32.mrb[22].mxu1  ;;  %v1232_v53 = vld [vmem:[%s3753_s3 + $0x38] sm:$0xff] }
 0x326   : > { %2529 = vrsqrt.f32 %v1090_v60  ;;  %v1028_v7 = vmax.f32 %v1020_v62, 0.0  ;;  %v1006_v9 = vmul.f32 0.00390625, %v2199_v4  ;;  %v982_v10 = vpop.f32.mrb[23].mxu1  ;;  %v1231_v62 = vld [vmem:[%s3753_s3 + $0x30] sm:$0xff] }
 0x327   : > { %v1027_v13 = vmax.f32 %v1019_v2, 0.0  ;;  %v1005_v14 = vmul.f32 0.00390625, %v982_v10  ;;  %2531 = vrsqrt.f32 %v1089_v1  ;;  %v1172_v1 = vpop.permute.xlu1 %1171 }
 0x328   : > { %v1092_v15 = vadd.f32 1e-05, %v1028_v7  ;;  %v1022_v16 = vsub.f32 %v1006_v9, %v1014_v6  ;;  %v1241_v9 = vpop.permute.xlu0 %1240 }
 0x329   : > { %v1091_v17 = vadd.f32 1e-05, %v1027_v13  ;;  %v1021_v0 = vsub.f32 %v1005_v14, %v1013_v12  ;;  %v2202_v20 = vpop.f32.mrb[24].mxu1 }
 0x32a   : > { %2533 = vrsqrt.f32 %v1092_v15  ;;  %v1030_v25 = vmax.f32 %v1022_v16, 0.0  ;;  %v1008_v31 = vmul.f32 0.00390625, %v2202_v20  ;;  %v992_v33 = vpop.f32.mrb[25].mxu1 }
 0x32b   : > { %v1029_v21 = vmax.f32 %v1021_v0, 0.0  ;;  %v1007_v40 = vmul.f32 0.00390625, %v992_v33  ;;  %2535 = vrsqrt.f32 %v1091_v17  ;;  %v1177_v2 = vpop.permute.xlu1 %1176 }
 0x32c   : > { %v1094_v41 = vadd.f32 1e-05, %v1030_v25  ;;  %v1024_v43 = vsub.f32 %v1008_v31, %v1016_v23  ;;  %v1187_v12 = vpop.permute.xlu0 %1186 }
 0x32d   : > { %v1093_v27 = vadd.f32 1e-05, %v1029_v21  ;;  %v1023_v45 = vsub.f32 %v1007_v40, %v1015_v35 }
 0x32e   : > { %2537 = vrsqrt.f32 %v1094_v41  ;;  %v1032_v46 = vmax.f32 %v1024_v43, 0.0 }
 0x32f   : > { %v1031_v47 = vmax.f32 %v1023_v45, 0.0  ;;  %2539 = vrsqrt.f32 %v1093_v27  ;;  %v3284_v4 = vpop.permute.xlu1 %1235 }
 0x330   : > { %v2530_v49 = vpop.eup %2529  ;;  %v1096_v51 = vadd.f32 1e-05, %v1032_v46  ;;  %v3294_v14 = vpop.permute.xlu0 %1250 }
 0x331   : > { %1112 = vperm.xlu1 %2527, %v2530_v49   ;;  %v1095_v29 = vadd.f32 1e-05, %v1031_v47  ;;  %v2532_v54 = vpop.eup %2531 }
 0x332   : > { %2541 = vrsqrt.f32 %v1096_v51 }
 0x333   : > { %2543 = vrsqrt.f32 %v1095_v29  ;;  %v3286_v6 = vpop.permute.xlu1 %1181 }
 0x334   : > { %v2534_v55 = vpop.eup %2533  ;;  %v1197_v16 = vpop.permute.xlu0 %1196 }
 0x335   : > { %1107 = vperm.xlu1 %2527, %v2532_v54   ;;  %1122 = vperm.xlu0 %2528, %v2534_v55   ;;  %v2536_v39 = vpop.eup %2535 }
 0x337   : > { %v3288_v7 = vpop.permute.xlu1 %1245 }
 0x338   : > { %v2538_v56 = vpop.eup %2537  ;;  %v3298_v0 = vpop.permute.xlu0 %1260 }
 0x339   : > { %1117 = vperm.xlu1 %2527, %v2536_v39   ;;  %1132 = vperm.xlu0 %2528, %v2538_v56   ;;  %v2540_v57 = vpop.eup %2539 }
 0x33b   : > { %v3290_v10 = vpop.permute.xlu1 %1191 }
 0x33c   : > { %v2542_v52 = vpop.eup %2541  ;;  %v3300_v23 = vpop.permute.xlu0 %1206 }
 0x33d   : > { %1127 = vperm.xlu1 %2527, %v2540_v57   ;;  %1142 = vperm.xlu0 %2528, %v2542_v52   ;;  %v2544_v60 = vpop.eup %2543 }
 0x33f   : > { %v3292_v13 = vpop.permute.xlu1 %1255 }
 0x341   : > { %1270 = vperm.xlu0 %2528, %v1232_v53   ;;  %1137 = vperm.xlu1 %2527, %v2544_v60  }
 0x343   : > { %v3296_v15 = vpop.permute.xlu1 %1201 }
 0x345   : > { %1265 = vperm.xlu1 %2527, %v1231_v62  }
 0x38f   : > { %v1041_v17 = vpop.permute.xlu1 %1040 }
 0x390   : > { %v1036_v31 = vpop.permute.xlu0 %1035  ;;  %v1075_v40 = vsub.f32 %v3140_v42, %v1041_v17  ;;  %v1076_v41 = vsub.f32 %v3142_v44, %v1041_v17 }
 0x391   : > { %v1073_v47 = vsub.f32 %v3130_v37, %v1036_v31  ;;  %v1074_v49 = vsub.f32 %v3132_v38, %v1036_v31 }
 0x393   : > { %v1051_v20 = vpop.permute.xlu1 %1050 }
 0x394   : > { %v1079_v51 = vsub.f32 %v3108_v18, %v1051_v20  ;;  %v1080_v29 = vsub.f32 %v3110_v19, %v1051_v20 }
 0x397   : > { %v1046_v25 = vpop.permute.xlu1 %1045  ;;  %v1061_v35 = vpop.permute.xlu0 %1060 }
 0x398   : > { %v1083_v54 = vsub.f32 %v3118_v26, %v1061_v35  ;;  %v1084_v55 = vsub.f32 %v3120_v28, %v1061_v35  ;;  %v1077_v44 = vsub.f32 %v3150_v48, %v1046_v25  ;;  %v1078_v56 = vsub.f32 %v3152_v50, %v1046_v25 }
 0x39b   : > { %v3302_v33 = vpop.permute.xlu1 %1055  ;;  %v1071_v43 = vpop.permute.xlu0 %1070 }
 0x39c   : > { %v1087_v57 = vsub.f32 %v3126_v34, %v1071_v43  ;;  %v1088_v37 = vsub.f32 %v3128_v36, %v1071_v43  ;;  %v1081_v26 = vsub.f32 %v3114_v22, %v3302_v33  ;;  %v1082_v28 = vsub.f32 %v3116_v24, %v3302_v33 }
 0x39f   : > { %v3304_v21 = vpop.permute.xlu1 %1065 }
 0x3a0   : > { %v1085_v34 = vsub.f32 %v3122_v30, %v3304_v21  ;;  %v1086_v17 = vsub.f32 %v3124_v32, %v3304_v21 }
 0x3b0   : > { %v1113_v27 = vpop.permute.xlu1 %1112 }
 0x3b1   : > { %v1147_v45 = vmul.f32 %v1113_v27, %v1075_v40  ;;  %v1148_v46 = vmul.f32 %v1113_v27, %v1076_v41 }
 0x3b3   : > { %v1211_v39 = vmul.f32 %v1177_v2, %v1147_v45  ;;  %v1212_v42 = vmul.f32 %v1177_v2, %v1148_v46 }
 0x3b4   : > { %v1123_v52 = vpop.permute.xlu0 %1122  ;;  %v1108_v38 = vpop.permute.xlu1 %1107 }
 0x3b5   : > { %v1151_v53 = vmul.f32 %v1123_v52, %v1079_v51  ;;  %v1152_v18 = vmul.f32 %v1123_v52, %v1080_v29  ;;  %v1145_v60 = vmul.f32 %v1108_v38, %v1073_v47  ;;  %v1146_v19 = vmul.f32 %v1108_v38, %v1074_v49 }
 0x3b6   : > { %v3322_v62 = vadd.f32 %v1241_v9, %v1211_v39  ;;  %v3324_v48 = vadd.f32 %v1241_v9, %v1212_v42 }
 0x3b7   : > { %v1215_v36 = vmul.f32 %v1187_v12, %v1151_v53  ;;  %v1209_v50 = vmul.f32 %v1172_v1, %v1145_v60  ;;  %v1210_v2 = vmul.f32 %v1172_v1, %v1146_v19  ;;  %v1216_v20 = vmul.f32 %v1187_v12, %v1152_v18 }
 0x3b8   : > { %v1133_v25 = vpop.permute.xlu0 %1132  ;;  %v1118_v31 = vpop.permute.xlu1 %1117  ;;  %v1291_v22 = vmax.f32 %v3322_v62, 0.0  ;;  %v1292_v24 = vmax.f32 %v3324_v48, 0.0 }
 0x3b9   : > { %v1155_v33 = vmul.f32 %v1133_v25, %v1083_v54  ;;  %v1156_v35 = vmul.f32 %v1133_v25, %v1084_v55  ;;  %v1149_v9 = vmul.f32 %v1118_v31, %v1077_v44  ;;  %v1150_v40 = vmul.f32 %v1118_v31, %v1078_v56 }
 0x3ba   : > { %v1308_v30 = vadd.f32 %v1292_v24, %v1291_v22  ;;  %v3337_v1 = vadd.f32 %v3284_v4, %v1209_v50  ;;  %v3340_v32 = vadd.f32 %v3284_v4, %v1210_v2  ;;  %v3343_v12 = vadd.f32 %v3294_v14, %v1215_v36 }
 0x3bb   : > { %v1219_v21 = vmul.f32 %v1197_v16, %v1155_v33  ;;  %v1220_v41 = vmul.f32 %v1197_v16, %v1156_v35  ;;  %v1213_v43 = vmul.f32 %v3286_v6, %v1149_v9  ;;  %v1214_v27 = vmul.f32 %v3286_v6, %v1150_v40 }
 0x3bc   : > { %1309 = vadd.xlane.f32.xlu0 %v1308_v30  ;;  %v1143_v45 = vpop.permute.xlu0 %1142  ;;  %v1128_v46 = vpop.permute.xlu1 %1127  ;;  %v1289_v47 = vmax.f32 %v3337_v1, 0.0  ;;  %v1290_v49 = vmax.f32 %v3340_v32, 0.0  ;;  %v3350_v51 = vadd.f32 %v3294_v14, %v1216_v20  ;;  %v1295_v4 = vmax.f32 %v3343_v12, 0.0 }
 0x3bd   : > { %v1159_v29 = vmul.f32 %v1143_v45, %v1087_v57  ;;  %v1160_v54 = vmul.f32 %v1143_v45, %v1088_v37  ;;  %v1153_v55 = vmul.f32 %v1128_v46, %v1081_v26  ;;  %v1154_v16 = vmul.f32 %v1128_v46, %v1082_v28  ;;  %v1337_v45 = vld [vmem:[%s3754_s4] sm:$0xff] }
 0x3be   : > { %v1305_v6 = vadd.f32 %v1290_v49, %v1289_v47  ;;  %v3774_v39 = vmax.f32 %v3350_v51, 0.0  ;;  %v3359_v42 = vadd.f32 %v3288_v7, %v1213_v43  ;;  %v3362_v44 = vadd.f32 %v3288_v7, %v1214_v27  ;;  %2219 = vmatprep.mubr.msk.f32.mxu1 %vm758_vm1, %v1337_v45  ;;  %v1341_v45 = vld [vmem:[%s3754_s4 + $0x20] sm:$0xff] }
 0x3bf   : > { %v1217_v14 = vmul.f32 %v3290_v10, %v1153_v55  ;;  %v1218_v56 = vmul.f32 %v3290_v10, %v1154_v16  ;;  %v1223_v57 = vmul.f32 %v3300_v23, %v1159_v29  ;;  %v1224_v37 = vmul.f32 %v3300_v23, %v1160_v54 }
 0x3c0   : > { %1306 = vadd.xlane.f32.xlu1 %v1305_v6  ;;  %v1271_v52 = vpop.permute.xlu0 %1270  ;;  %v1138_v38 = vpop.permute.xlu1 %1137  ;;  %v1314_v53 = vadd.f32 %v3774_v39, %v1295_v4  ;;  %v3773_v18 = vmax.f32 %v3359_v42, 0.0  ;;  %v3772_v7 = vmax.f32 %v3362_v44, 0.0  ;;  %v3375_v60 = vadd.f32 %v3298_v0, %v1219_v21 }
 0x3c1   : > { %v3377_v10 = vadd.f32 %v1271_v52, %v1223_v57  ;;  %v3379_v19 = vadd.f32 %v1271_v52, %v1224_v37  ;;  %v1157_v23 = vmul.f32 %v1138_v38, %v1085_v34  ;;  %v1158_v26 = vmul.f32 %v1138_v38, %v1086_v17 }
 0x3c2   : > { %v1311_v28 = vadd.f32 %v3772_v7, %v3773_v18  ;;  %v3386_v36 = vadd.f32 %v3298_v0, %v1220_v41  ;;  %v3771_v50 = vmax.f32 %v3375_v60, 0.0  ;;  %v3390_v2 = vadd.f32 %v3292_v13, %v1217_v14 }
 0x3c3   : > { %v1221_v20 = vmul.f32 %v3296_v15, %v1157_v23  ;;  %v1222_v25 = vmul.f32 %v3296_v15, %v1158_v26  ;;  %v3396_v31 = vadd.f32 %v3292_v13, %v1218_v56  ;;  %v3767_v9 = vmax.f32 %v3377_v10, 0.0 }
 0x3c4   : > { %1315 = vadd.xlane.f32.xlu1 %v1314_v53  ;;  %1312 = vadd.xlane.f32.xlu0 %v1311_v28  ;;  %v1266_v34 = vpop.permute.xlu1 %1265  ;;  %v3770_v17 = vmax.f32 %v3386_v36, 0.0  ;;  %v3769_v0 = vmax.f32 %v3390_v2, 0.0  ;;  %v3766_v40 = vmax.f32 %v3379_v19, 0.0  ;;  %v3790_v32 = vmax.f32 %v3359_v42, 0.0 }
 0x3c5   : > { %v3399_v33 = vadd.f32 %v1266_v34, %v1221_v20  ;;  %v3401_v35 = vadd.f32 %v1266_v34, %v1222_v25  ;;  %v3768_v30 = vmax.f32 %v3396_v31, 0.0 }
 0x3c6   : > { %v1320_v15 = vadd.f32 %v3770_v17, %v3771_v50  ;;  %v1326_v43 = vadd.f32 %v3766_v40, %v3767_v9 }
 0x3c7   : > { %v3765_v13 = vmax.f32 %v3399_v33, 0.0  ;;  %v3764_v21 = vmax.f32 %v3401_v35, 0.0  ;;  %v1317_v41 = vadd.f32 %v3768_v30, %v3769_v0 }
 0x3c8   : > { %1321 = vadd.xlane.f32.xlu1 %v1320_v15 }
 0x3c9   : > { %1318 = vadd.xlane.f32.xlu0 %v1317_v41  ;;  %v1323_v27 = vadd.f32 %v3764_v21, %v3765_v13  ;;  %v1338_v41 = vld [vmem:[%s3754_s4 + $0x8] sm:$0xff] }
 0x3cc   : > { %1327 = vadd.xlane.f32.xlu1 %v1326_v43  ;;  %v1339_v43 = vld [vmem:[%s3754_s4 + $0x10] sm:$0xff] }
 0x3cd   : > { %1324 = vadd.xlane.f32.xlu0 %v1323_v27  ;;  %v1340_v27 = vld [vmem:[%s3754_s4 + $0x18] sm:$0xff] }
 0x449   : > { %v1310_v46 = vpop.xlane.xlu0 %1309 }
 0x44a   : > { %v1330_v54 = vmul.f32 0.00390625, %v1310_v46  ;;  %v1342_v46 = vld [vmem:[%s3754_s4 + $0x28] sm:$0xff] }
 0x44d   : > { %v1307_v29 = vpop.xlane.xlu1 %1306 }
 0x44e   : > { %v1329_v55 = vmul.f32 0.00390625, %v1307_v29  ;;  %v1343_v29 = vld [vmem:[%s3754_s4 + $0x30] sm:$0xff] }
 0x450   : > { %v2391_v16 = vpack.c.bf16 %v1330_v54, %v1329_v55  ;;  %v1344_v54 = vld [vmem:[%s3754_s4 + $0x38] sm:$0xff] }
 0x451   : > { %v1313_v6 = vpop.xlane.xlu0 %1312  ;;  %v1316_v14 = vpop.xlane.xlu1 %1315 }
 0x452   : > { %v1331_v56 = vmul.f32 0.00390625, %v1313_v6  ;;  %v1332_v57 = vmul.f32 0.00390625, %v1316_v14  ;;  %2392 = vmatprep.subr.bf16.mxu1 %v2391_v16 }
 0x453   : > { %2394 = vmatpush3.bf16.msra.mxu1 %v2391_v16 }
 0x454   : > { %v2395_v37 = vpack.c.bf16 %v1332_v57, %v1331_v56 }
 0x455   : > { %v1322_v52 = vpop.xlane.xlu1 %1321 }
 0x456   : > { %v1334_v38 = vmul.f32 0.00390625, %v1322_v52  ;;  %2396 = vmatprep.subr.bf16.mxu1 %v2395_v37  ;;  %v1319_v53 = vpop.xlane.xlu0 %1318 }
 0x457   : > { %2398 = vmatpush3.bf16.msra.mxu1 %v2395_v37  ;;  %v1333_v23 = vmul.f32 0.00390625, %v1319_v53 }
 0x459   : > { %v1328_v26 = vpop.xlane.xlu1 %1327  ;;  %v2399_v28 = vpack.c.bf16 %v1334_v38, %v1333_v23 }
 0x45a   : > { %v1336_v20 = vmul.f32 0.00390625, %v1328_v26  ;;  %v1325_v25 = vpop.xlane.xlu0 %1324 }
 0x45b   : > { %v1335_v34 = vmul.f32 0.00390625, %v1325_v25  ;;  %2400 = vmatprep.subr.bf16.mxu1 %v2399_v28 }
 0x45c   : > { %2402 = vmatpush3.bf16.msra.mxu1 %v2399_v28 }
 0x45d   : > { %v2403_v15 = vpack.c.bf16 %v1336_v20, %v1335_v34 }
 0x45f   : > { %2404 = vmatprep.subr.bf16.mxu1 %v2403_v15 }
 0x460   : > { %2406 = vmatpush3.bf16.msra.mxu1 %v2403_v15 }
 0x463   : > { %2220 = vmatmul.mubr.msk.f32.vlgmr.msra.gmra.mrb[26].mxu1 %vm758_vm1, %v1338_v41 }
 0x464   : > { %2222 = vmatprep.mubr.msk.f32.mxu1 %vm758_vm1, %v1339_v43 }
 0x467   : > { %2223 = vmatmul.mubr.msk.f32.gmra.mrb[28].mxu1 %vm758_vm1, %v1340_v27 }
 0x468   : > { %2225 = vmatprep.mubr.msk.f32.mxu1 %vm758_vm1, %v1341_v45 }
 0x46b   : > { %2226 = vmatmul.mubr.msk.f32.gmra.mrb[30].mxu1 %vm758_vm1, %v1342_v46 }
 0x46c   : > { %2228 = vmatprep.mubr.msk.f32.mxu1 %vm758_vm1, %v1343_v29 }
 0x46f   : > { %2229 = vmatmul.mubr.msk.f32.gmra.mrb[32].mxu1 %vm758_vm1, %v1344_v54 }
 0x470   : > { %2247 = vmatprep.mubr.msk.f32.mxu1 %vm758_vm1, %v3188_v11 }
 0x536   : > { %v3458_v55 = vpop.f32.mrb[26].mxu1 }
 0x537   : > { %v1580_v16 = vmul.f32 %v3458_v55, %v3458_v55  ;;  %v3462_v6 = vpop.f32.mrb[27].mxu1 }
 0x538   : > { %v2407_v14 = vpack.c.bf16 %v3458_v55, %v3462_v6  ;;  %v1579_v56 = vmul.f32 %v3462_v6, %v3462_v6 }
 0x53a   : > { %v3468_v57 = vpop.f32.mrb[28].mxu1  ;;  %2408 = vmatprep.subr.bf16.mxu1 %v2407_v14  ;;  %v2423_v37 = vpack.c.bf16 %v1580_v16, %v1579_v56 }
 0x53b   : > { %v1582_v52 = vmul.f32 %v3468_v57, %v3468_v57  ;;  %v3472_v38 = vpop.f32.mrb[29].mxu1  ;;  %2410 = vmatpush3.bf16.msra.mxu1 %v2407_v14 }
 0x53c   : > { %v2411_v53 = vpack.c.bf16 %v3468_v57, %v3472_v38  ;;  %v1581_v23 = vmul.f32 %v3472_v38, %v3472_v38 }
 0x53e   : > { %v3478_v26 = vpop.f32.mrb[30].mxu1  ;;  %2412 = vmatprep.subr.bf16.mxu1 %v2411_v53  ;;  %v2427_v28 = vpack.c.bf16 %v1582_v52, %v1581_v23 }
 0x53f   : > { %v1584_v20 = vmul.f32 %v3478_v26, %v3478_v26  ;;  %v3482_v25 = vpop.f32.mrb[31].mxu1  ;;  %2414 = vmatpush3.bf16.msra.mxu1 %v2411_v53 }
 0x540   : > { %v2415_v34 = vpack.c.bf16 %v3478_v26, %v3482_v25  ;;  %v1583_v15 = vmul.f32 %v3482_v25, %v3482_v25 }
 0x542   : > { %v3488_v41 = vpop.f32.mrb[32].mxu1  ;;  %2416 = vmatprep.subr.bf16.mxu1 %v2415_v34  ;;  %v2431_v43 = vpack.c.bf16 %v1584_v20, %v1583_v15 }
 0x543   : > { %v1586_v27 = vmul.f32 %v3488_v41, %v3488_v41  ;;  %v3492_v45 = vpop.f32.mrb[33].mxu1  ;;  %2418 = vmatpush3.bf16.msra.mxu1 %v2415_v34 }
 0x544   : > { %v2419_v46 = vpack.c.bf16 %v3488_v41, %v3492_v45  ;;  %v1585_v29 = vmul.f32 %v3492_v45, %v3492_v45 }
 0x546   : > { %2420 = vmatprep.subr.bf16.mxu1 %v2419_v46  ;;  %v2435_v54 = vpack.c.bf16 %v1586_v27, %v1585_v29 }
 0x547   : > { %2422 = vmatpush3.bf16.msra.mxu1 %v2419_v46 }
 0x548   : > { %2424 = vmatprep.subr.bf16.mxu1 %v2423_v37 }
 0x54a   : > { %2248 = vmatmul.mubr.msk.f32.vlgmr.msra.gmra.mrb[34].mxu1 %vm758_vm1, %v3234_v58 }
 0x54b   : > { %2426 = vmatpush3.bf16.msra.mxu1 %v2423_v37  ;;  %2250 = vmatprep.mubr.msk.f32.mxu1 %vm758_vm1, %v3236_v59 }
 0x54c   : > { %2428 = vmatprep.subr.bf16.mxu1 %v2427_v28 }
 0x54e   : > { %2251 = vmatmul.mubr.msk.f32.gmra.mrb[36].mxu1 %vm758_vm1, %v3242_v61 }
 0x54f   : > { %2430 = vmatpush3.bf16.msra.mxu1 %v2427_v28  ;;  %2253 = vmatprep.mubr.msk.f32.mxu1 %vm758_vm1, %v3244_v63 }
 0x550   : > { %2432 = vmatprep.subr.bf16.mxu1 %v2431_v43 }
 0x552   : > { %2254 = vmatmul.mubr.msk.f32.gmra.mrb[38].mxu1 %vm758_vm1, %v3250_v3 }
 0x553   : > { %2434 = vmatpush3.bf16.msra.mxu1 %v2431_v43  ;;  %2256 = vmatprep.mubr.msk.f32.mxu1 %vm758_vm1, %v3252_v5 }
 0x554   : > { %2436 = vmatprep.subr.bf16.mxu1 %v2435_v54 }
 0x556   : > { %2257 = vmatmul.mubr.msk.f32.gmra.mrb[40].mxu1 %vm758_vm1, %v3258_v8 }
 0x557   : > { %2438 = vmatpush3.bf16.msra.mxu1 %v2435_v54  ;;  %2275 = vmatprep.mubr.msk.f32.mxu1 %vm758_vm1, %v3188_v11 }
 0x55a   : > { %2276 = vmatmul.mubr.msk.f32.vlgmr.msra.gmra.mrb[42].mxu1 %vm758_vm1, %v3234_v58 }
 0x55b   : > { %2278 = vmatprep.mubr.msk.f32.mxu1 %vm758_vm1, %v3236_v59 }
 0x55e   : > { %2279 = vmatmul.mubr.msk.f32.gmra.mrb[44].mxu1 %vm758_vm1, %v3242_v61 }
 0x55f   : > { %2281 = vmatprep.mubr.msk.f32.mxu1 %vm758_vm1, %v3244_v63 }
 0x562   : > { %2282 = vmatmul.mubr.msk.f32.gmra.mrb[46].mxu1 %vm758_vm1, %v3250_v3 }
 0x563   : > { %2284 = vmatprep.mubr.msk.f32.mxu1 %vm758_vm1, %v3252_v5 }
 0x566   : > { %2285 = vmatmul.mubr.msk.f32.gmra.mrb[48].mxu1 %vm758_vm1, %v3258_v8 }
 0x61d   : > { %v3528_v11 = vpop.f32.mrb[34].mxu1 }
 0x61e   : > { %v1717_v58 = vsub.f32 %v3458_v55, %v3528_v11  ;;  %v3532_v59 = vpop.f32.mrb[35].mxu1  ;;  %v1693_v20 = vmul.f32 %v3528_v11, %v3528_v11  ;;  %v1764_v55 = vld [vmem:[%s3756_s6] sm:$0xff] }
 0x61f   : > { %v1716_v61 = vsub.f32 %v3462_v6, %v3532_v59  ;;  %v1692_v34 = vmul.f32 %v3532_v59, %v3532_v59  ;;  %v1750_v59 = vld [vmem:[%s3755_s5 + $0x10] sm:$0xff] }
 0x621   : > { %v3536_v63 = vpop.f32.mrb[36].mxu1 }
 0x622   : > { %v1719_v3 = vsub.f32 %v3468_v57, %v3536_v63  ;;  %v3540_v16 = vpop.f32.mrb[37].mxu1  ;;  %v1695_v29 = vmul.f32 %v3536_v63, %v3536_v63  ;;  %v1766_v57 = vld [vmem:[%s3756_s6 + $0x10] sm:$0xff] }
 0x623   : > { %v1718_v5 = vsub.f32 %v3472_v38, %v3540_v16  ;;  %v1694_v21 = vmul.f32 %v3540_v16, %v3540_v16  ;;  %v1752_v16 = vld [vmem:[%s3755_s5 + $0x20] sm:$0xff] }
 0x625   : > { %v3544_v8 = vpop.f32.mrb[38].mxu1 }
 0x626   : > { %v1721_v14 = vsub.f32 %v3478_v26, %v3544_v8  ;;  %v3548_v56 = vpop.f32.mrb[39].mxu1  ;;  %v1697_v7 = vmul.f32 %v3544_v8, %v3544_v8  ;;  %v1768_v26 = vld [vmem:[%s3756_s6 + $0x20] sm:$0xff] }
 0x627   : > { %v1720_v37 = vsub.f32 %v3482_v25, %v3548_v56 }
 0x629   : > { %v3552_v52 = vpop.f32.mrb[40].mxu1 }
 0x62a   : > { %v1723_v53 = vsub.f32 %v3488_v41, %v3552_v52  ;;  %v3556_v23 = vpop.f32.mrb[41].mxu1  ;;  %v1770_v41 = vld [vmem:[%s3756_s6 + $0x30] sm:$0xff] }
 0x62b   : > { %v1722_v28 = vsub.f32 %v3492_v45, %v3556_v23 }
 0x62d   : > { %v2277_v15 = vpop.f32.mrb[42].mxu1 }
 0x62e   : > { %v1701_v43 = vsub.f32 %v2277_v15, %v1693_v20  ;;  %v1653_v27 = vpop.f32.mrb[43].mxu1 }
 0x62f   : > { %v1700_v46 = vsub.f32 %v1653_v27, %v1692_v34  ;;  %v1696_v34 = vmul.f32 %v3548_v56, %v3548_v56  ;;  %v1754_v56 = vld [vmem:[%s3755_s5 + $0x30] sm:$0xff] }
 0x630   : > { %v1709_v54 = vmax.f32 %v1701_v43, 0.0 }
 0x631   : > { %v1708_v13 = vmax.f32 %v1700_v46, 0.0  ;;  %v2280_v40 = vpop.f32.mrb[44].mxu1 }
 0x632   : > { %v1725_v9 = vadd.f32 1e-05, %v1709_v54  ;;  %v1703_v30 = vsub.f32 %v2280_v40, %v1695_v29  ;;  %v1663_v0 = vpop.f32.mrb[45].mxu1  ;;  %v1699_v40 = vmul.f32 %v3552_v52, %v3552_v52 }
 0x633   : > { %v1724_v17 = vadd.f32 1e-05, %v1708_v13  ;;  %v1702_v50 = vsub.f32 %v1663_v0, %v1694_v21 }
 0x634   : > { %2545 = vrsqrt.f32 %v1725_v9  ;;  %v1711_v20 = vmax.f32 %v1703_v30, 0.0  ;;  %v1698_v9 = vmul.f32 %v3556_v23, %v3556_v23 }
 0x635   : > { %2547 = vrsqrt.f32 %v1724_v17  ;;  %v1710_v15 = vmax.f32 %v1702_v50, 0.0  ;;  %v2283_v43 = vpop.f32.mrb[46].mxu1 }
 0x636   : > { %v1727_v27 = vadd.f32 1e-05, %v1711_v20  ;;  %v1705_v18 = vsub.f32 %v2283_v43, %v1697_v7  ;;  %v1673_v46 = vpop.f32.mrb[47].mxu1 }
 0x637   : > { %v1726_v39 = vadd.f32 1e-05, %v1710_v15  ;;  %v1704_v54 = vsub.f32 %v1673_v46, %v1696_v34  ;;  %v1748_v46 = vld [vmem:[%s3755_s5] sm:$0xff] }
 0x638   : > { %2549 = vrsqrt.f32 %v1727_v27  ;;  %v1713_v0 = vmax.f32 %v1705_v18, 0.0  ;;  %v1749_v18 = vld [vmem:[%s3755_s5 + $0x8] sm:$0xff] }
 0x639   : > { %2551 = vrsqrt.f32 %v1726_v39  ;;  %v1712_v30 = vmax.f32 %v1704_v54, 0.0  ;;  %v2286_v13 = vpop.f32.mrb[48].mxu1 }
 0x63a   : > { %v1729_v21 = vadd.f32 1e-05, %v1713_v0  ;;  %v1707_v17 = vsub.f32 %v2286_v13, %v1699_v40  ;;  %v1683_v50 = vpop.f32.mrb[49].mxu1  ;;  %v1765_v40 = vld [vmem:[%s3756_s6 + $0x8] sm:$0xff] }
 0x63b   : > { %v1728_v29 = vadd.f32 1e-05, %v1712_v30  ;;  %v1706_v20 = vsub.f32 %v1683_v50, %v1698_v9  ;;  %v1751_v30 = vld [vmem:[%s3755_s5 + $0x18] sm:$0xff] }
 0x63c   : > { %2553 = vrsqrt.f32 %v1729_v21  ;;  %v1715_v7 = vmax.f32 %v1707_v17, 0.0  ;;  %v1767_v17 = vld [vmem:[%s3756_s6 + $0x18] sm:$0xff] }
 0x63d   : > { %2555 = vrsqrt.f32 %v1728_v29  ;;  %v1714_v34 = vmax.f32 %v1706_v20, 0.0 }
 0x63e   : > { %v2546_v15 = vpop.eup %2545  ;;  %v1731_v43 = vadd.f32 1e-05, %v1715_v7 }
 0x63f   : > { %v2548_v27 = vpop.eup %2547  ;;  %v1741_v39 = vmul.f32 %v2546_v15, %v1717_v58  ;;  %v1730_v54 = vadd.f32 1e-05, %v1714_v34  ;;  %v1753_v34 = vld [vmem:[%s3755_s5 + $0x28] sm:$0xff] }
 0x640   : > { %v1740_v0 = vmul.f32 %v2548_v27, %v1716_v61  ;;  %2557 = vrsqrt.f32 %v1731_v43  ;;  %v1769_v43 = vld [vmem:[%s3756_s6 + $0x28] sm:$0xff] }
 0x641   : > { %v1757_v9 = vmul.f32 %v1749_v18, %v1741_v39  ;;  %2559 = vrsqrt.f32 %v1730_v54 }
 0x642   : > { %v2550_v11 = vpop.eup %2549  ;;  %v1756_v58 = vmul.f32 %v1748_v46, %v1740_v0 }
 0x643   : > { %v2552_v13 = vpop.eup %2551  ;;  %v1773_v21 = vadd.f32 %v1765_v40, %v1757_v9  ;;  %v1743_v6 = vmul.f32 %v2550_v11, %v1719_v3  ;;  %v1755_v40 = vld [vmem:[%s3755_s5 + $0x38] sm:$0xff] }
 0x644   : > { %v1772_v61 = vadd.f32 %v1764_v55, %v1756_v58  ;;  %v1742_v50 = vmul.f32 %v2552_v13, %v1718_v5  ;;  %v1771_v55 = vld [vmem:[%s3756_s6 + $0x38] sm:$0xff] }
 0x645   : > { %v2054_v29 = vmul.f32 -1.442695, %v1773_v21  ;;  %v1759_v20 = vmul.f32 %v1751_v30, %v1743_v6 }
 0x646   : > { %v2554_v63 = vpop.eup %2553  ;;  %v2053_v3 = vmul.f32 -1.442695, %v1772_v61  ;;  %v1758_v7 = vmul.f32 %v1750_v59, %v1742_v50 }
 0x647   : > { %v2556_v15 = vpop.eup %2555  ;;  %2561 = vpow2.f32 %v2054_v29  ;;  %v1775_v18 = vadd.f32 %v1767_v17, %v1759_v20  ;;  %v1745_v38 = vmul.f32 %v2554_v63, %v1721_v14 }
 0x648   : > { %2563 = vpow2.f32 %v2053_v3  ;;  %v1774_v5 = vadd.f32 %v1766_v57, %v1758_v7  ;;  %v1744_v27 = vmul.f32 %v2556_v15, %v1720_v37 }
 0x649   : > { %v2056_v39 = vmul.f32 -1.442695, %v1775_v18  ;;  %v1761_v46 = vmul.f32 %v1753_v34, %v1745_v38 }
 0x64a   : > { %v2558_v8 = vpop.eup %2557  ;;  %v2055_v14 = vmul.f32 -1.442695, %v1774_v5  ;;  %v1760_v54 = vmul.f32 %v1752_v16, %v1744_v27 }
 0x64b   : > { %v2560_v0 = vpop.eup %2559  ;;  %2565 = vpow2.f32 %v2056_v39  ;;  %v1777_v9 = vadd.f32 %v1769_v43, %v1761_v46  ;;  %v1747_v25 = vmul.f32 %v2558_v8, %v1723_v53 }
 0x64c   : > { %2567 = vpow2.f32 %v2055_v14  ;;  %v1776_v37 = vadd.f32 %v1768_v26, %v1760_v54  ;;  %v1746_v11 = vmul.f32 %v2560_v0, %v1722_v28 }
 0x64d   : > { %v2058_v58 = vmul.f32 -1.442695, %v1777_v9  ;;  %v1763_v30 = vmul.f32 %v1755_v40, %v1747_v25 }
 0x64e   : > { %v2057_v52 = vmul.f32 -1.442695, %v1776_v37  ;;  %v1762_v53 = vmul.f32 %v1754_v56, %v1746_v11  ;;  %v3794_v11 = vmax.f32 %v3390_v2, 0.0  ;;  %v3797_v2 = vmax.f32 %v3379_v19, 0.0 }
 0x64f   : > { %2569 = vpow2.f32 %v2058_v58  ;;  %v1779_v13 = vadd.f32 %v1771_v55, %v1763_v30  ;;  %v3793_v55 = vmax.f32 %v3386_v36, 0.0  ;;  %v3795_v58 = vmax.f32 %v3396_v31, 0.0 }
 0x650   : > { %2571 = vpow2.f32 %v2057_v52  ;;  %v1778_v21 = vadd.f32 %v1770_v41, %v1762_v53  ;;  %v3796_v36 = vmax.f32 %v3377_v10, 0.0  ;;  %v3798_v31 = vmax.f32 %v3399_v33, 0.0 }
 0x651   : > { %v2562_v6 = vpop.eup %2561  ;;  %v2060_v59 = vmul.f32 -1.442695, %v1779_v13  ;;  %v3799_v13 = vmax.f32 %v3401_v35, 0.0 }
 0x652   : > { %v2564_v61 = vpop.eup %2563  ;;  %v1805_v17 = vadd.f32 1.0, %v2562_v6  ;;  %v2059_v50 = vmul.f32 -1.442695, %v1778_v21 }
 0x653   : > { %v1804_v29 = vadd.f32 1.0, %v2564_v61  ;;  %2573 = vpow2.f32 %v2060_v59 }
 0x654   : > { %2575 = vrcp.f32 %v1805_v17 }
 0x655   : > { %v2566_v45 = vpop.eup %2565  ;;  %2577 = vrcp.f32 %v1804_v29 }
 0x656   : > { %v2568_v23 = vpop.eup %2567  ;;  %v1807_v28 = vadd.f32 1.0, %v2566_v45  ;;  %2579 = vpow2.f32 %v2059_v50 }
 0x657   : > { %v1806_v20 = vadd.f32 1.0, %v2568_v23 }
 0x658   : > { %2581 = vrcp.f32 %v1807_v28 }
 0x659   : > { %v2570_v57 = vpop.eup %2569  ;;  %2583 = vrcp.f32 %v1806_v20 }
 0x65a   : > { %v2572_v63 = vpop.eup %2571  ;;  %v1809_v3 = vadd.f32 1.0, %v2570_v57 }
 0x65b   : > { %v1808_v7 = vadd.f32 1.0, %v2572_v63 }
 0x65c   : > { %2585 = vrcp.f32 %v1809_v3 }
 0x65d   : > { %v2574_v34 = vpop.eup %2573  ;;  %2587 = vrcp.f32 %v1808_v7 }
 0x65e   : > { %v2576_v15 = vpop.eup %2575  ;;  %v1811_v18 = vadd.f32 1.0, %v2574_v34 }
 0x65f   : > { %v2578_v38 = vpop.eup %2577  ;;  %1835 = vperm.xlu1 %2527, %v2576_v15  }
 0x660   : > { %v2580_v16 = vpop.eup %2579  ;;  %2589 = vrcp.f32 %v1811_v18  ;;  %1830 = vperm.xlu0 %2528, %v2578_v38  }
 0x661   : > { %v1810_v5 = vadd.f32 1.0, %v2580_v16 }
 0x662   : > { %v2582_v43 = vpop.eup %2581 }
 0x663   : > { %v2584_v27 = vpop.eup %2583  ;;  %2591 = vrcp.f32 %v1810_v5 }
 0x664   : > { %1845 = vperm.xlu0 %2528, %v2582_v43   ;;  %1840 = vperm.xlu1 %2527, %v2584_v27  }
 0x666   : > { %v2586_v39 = vpop.eup %2585 }
 0x667   : > { %v2588_v46 = vpop.eup %2587 }
 0x668   : > { %1855 = vperm.xlu0 %2528, %v2586_v39   ;;  %1850 = vperm.xlu1 %2527, %v2588_v46  }
 0x66a   : > { %v2590_v26 = vpop.eup %2589 }
 0x66c   : > { %1865 = vperm.xlu0 %2528, %v2590_v26  }
 0x66d   : > { %v2592_v8 = vpop.eup %2591 }
 0x66e   : > { %1860 = vperm.xlu1 %2527, %v2592_v8  }
 0x6de   : > { %v1836_v14 = vpop.permute.xlu1 %1835 }
 0x6df   : > { %v1870_v54 = vmul.f32 %v1836_v14, %v1291_v22  ;;  %v1871_v40 = vmul.f32 %v1836_v14, %v1292_v24  ;;  %v1831_v0 = vpop.permute.xlu0 %1830  ;;  %v3789_v24 = vmax.f32 %v3350_v51, 0.0 }
 0x6e0   : > { %v1868_v9 = vmul.f32 %v1831_v0, %v1289_v47  ;;  %v1869_v25 = vmul.f32 %v1831_v0, %v1290_v49  ;;  %v3791_v49 = vmax.f32 %v3362_v44, 0.0 }
 0x6e1   : > { %1886 = vst [vmem:[%s3657_s19 + $0x10] sm:$0xff] %v1870_v54  ;;  %1887 = vst [vmem:[%s3657_s19 + $0x18] sm:$0xff] %v1871_v40 }
 0x6e2   : > { %1884 = vst [vmem:[%s3657_s19] sm:$0xff] %v1868_v9  ;;  %1885 = vst [vmem:[%s3657_s19 + $0x8] sm:$0xff] %v1869_v25 }
 0x6e3   : > { %v1846_v62 = vpop.permute.xlu0 %1845  ;;  %v1841_v48 = vpop.permute.xlu1 %1840 }
 0x6e4   : > { %v1874_v22 = vmul.f32 %v1846_v62, %v1295_v4  ;;  %v1875_v1 = vmul.f32 %v1846_v62, %v3789_v24  ;;  %v1872_v47 = vmul.f32 %v1841_v48, %v3790_v32  ;;  %v1873_v56 = vmul.f32 %v1841_v48, %v3791_v49 }
 0x6e5   : > { %v3792_v4 = vmax.f32 %v3375_v60, 0.0 }
 0x6e6   : > { %1890 = vst [vmem:[%s3657_s19 + $0x30] sm:$0xff] %v1874_v22  ;;  %1891 = vst [vmem:[%s3657_s19 + $0x38] sm:$0xff] %v1875_v1 }
 0x6e7   : > { %1888 = vst [vmem:[%s3657_s19 + $0x20] sm:$0xff] %v1872_v47  ;;  %1889 = vst [vmem:[%s3657_s19 + $0x28] sm:$0xff] %v1873_v56  ;;  %v1856_v12 = vpop.permute.xlu0 %1855  ;;  %v1851_v37 = vpop.permute.xlu1 %1850 }
 0x6e8   : > { %v1878_v51 = vmul.f32 %v1856_v12, %v3792_v4  ;;  %v1879_v42 = vmul.f32 %v1856_v12, %v3793_v55  ;;  %v1876_v44 = vmul.f32 %v1851_v37, %v3794_v11  ;;  %v1877_v30 = vmul.f32 %v1851_v37, %v3795_v58 }
 0x6ea   : > { %1894 = vst [vmem:[%s3657_s19 + $0x50] sm:$0xff] %v1878_v51  ;;  %1895 = vst [vmem:[%s3657_s19 + $0x58] sm:$0xff] %v1879_v42 }
 0x6eb   : > { %1892 = vst [vmem:[%s3657_s19 + $0x40] sm:$0xff] %v1876_v44  ;;  %1893 = vst [vmem:[%s3657_s19 + $0x48] sm:$0xff] %v1877_v30  ;;  %v1866_v60 = vpop.permute.xlu0 %1865 }
 0x6ec   : > { %v1882_v41 = vmul.f32 %v1866_v60, %v3796_v36  ;;  %v1883_v52 = vmul.f32 %v1866_v60, %v3797_v2 }
 0x6ed   : > { %v1861_v53 = vpop.permute.xlu1 %1860 }
 0x6ee   : > { %1898 = vst [vmem:[%s3657_s19 + $0x70] sm:$0xff] %v1882_v41  ;;  %1899 = vst [vmem:[%s3657_s19 + $0x78] sm:$0xff] %v1883_v52  ;;  %v1880_v10 = vmul.f32 %v1861_v53, %v3798_v31  ;;  %v1881_v19 = vmul.f32 %v1861_v53, %v3799_v13 }
 0x6f0   : > { %1896 = vst [vmem:[%s3657_s19 + $0x60] sm:$0xff] %v1880_v10  ;;  %1897 = vst [vmem:[%s3657_s19 + $0x68] sm:$0xff] %v1881_v19 }
 0x6f1   : > { %2664 = shalt.err (!%p2661_p7)
}
 0x6f2   : > { %s2665_s11 = scalar_lea.hbm %s3696_s7, 2048  ;;  %s2669_s15 = scalar_lea.hbm %s3758_s8, 4096 }
 0x6f3   : > { %p2666_p9 = scmp.ne.s32.totalorder %s3696_s7, %s2665_s11  ;;  %p2670_p5 = scmp.lt.u32.totalorder %s3696_s7, %s3758_s8 }
 0x6f4   : > { %p2671_p11 = scmp.lt.u32.totalorder %s2669_s15, %s2665_s11  ;;  %p2673_p4 = scmp.lt.u32.totalorder %s2665_s11, %s3696_s7 }
 0x6f5   : > { %p2667_p2 = pnand %p2666_p9, %p2870_p12 }
 0x6f6   : > { %p2672_p1 = por %p2671_p11, %p2670_p5 }
 0x6f7   : > { %p2668_p0 = pneg %p2667_p2 }
 0x6f8   : > { %p2674_p6 = por %p2673_p4, %p2672_p1 }
 0x6fa   : > { %p2675_p8 = pnand %p2674_p6, %p2668_p0 }
 0x6fc   : > { %2678 = shalt.err (!%p2675_p8)
}
 0x6fd   : > { %s2732_s10 = smov 256   ;;  %s2733_s18 = smov 16  }
 0x6fe   : > { %2468 = dma.vmem_to_hbm [thread:$0]  (%p2870_p12), %s3698_s14, 2048, %s3696_s7, %s1901_s9, %s2732_s10, %s2732_s10, %s2733_s18  }
 0x6ff PF: > { %s1929_s20 = sand.u32 1, %s2709_s27   ;;  %p3800_p10 = scmp.ne.s32.totalorder %s3777_s12, 0 }
 0x700   : > { %p3801_p13 = scmp.ge.s32.totalorder %s2721_s30, 2  ;;  %s1930_s17 = scalar_lea.sflag [#allocation4], %s1929_s20 }
 0x702   : > { %p2479_p3 = pnand %p3801_p13, %p3800_p10 }
 0x704   : > { %2704 = dma.done.wait (!%p2479_p3), %s1930_s17, 2048  }
 0x705   : > { %2706 = vsyncadd (!%p2479_p3), %s1930_s17, 4294965248  ;;  %s3802_s30 = sld [smem:[#allocation11_spill]]  ;;  %s3803_s27 = smov %s2713_s28 }
 0x706   : > { %s3804_s28 = smov %s2717_s29  ;;  %s3805_s29 = smov %s2866_s23 }
 0x70b   : > { %p22_p7 = scmp.ge.s32.totalorder %s3802_s30, 4  }
 0x70d   :  { %24 = sbr.rel (!%p22_p7) target bundleno = 8 (0x8), region = 101 }
 0x714   :  { %1935 = vsyncpa [#allocation3], 1 }
 0x715   :  { %1937 = vsyncpa [#allocation3 + $0x1], 1 }
 0x716   :  { %1938 = vsyncpa [#allocation6], 1 }
 0x717   :  { %1939 = vsyncpa [#allocation4], 1 }
 0x718   :  { %1941 = vsyncpa [#allocation4 + $0x1], 1 }

</bundles_post_ra>
